<compile_context>
chip_gen: v5e
topology: v5e:2x2
jax: 0.10.0
libtpu: 0.0.40
codegen_flags: <defaults>
</compile_context>

<pallas_src>
import numpy as np
import jax
import jax.numpy as jnp
from jax.experimental import pallas as pl
from jax.experimental.pallas import tpu as pltpu

EPS = 1e-5             # nn.LayerNorm default eps
DEFAULT_TILE_N = 512   # rows per grid step (multiple of 8)


def _round_up(x, m):
    return ((x + m - 1) // m) * m


def _interp_matrix(src, dst):
    """W (src, dst) s.t. x @ W == F.interpolate(x, dst, mode='linear', align_corners=True)."""
    if src == dst:
        return np.eye(src, dtype=np.float32)
    W = np.zeros((src, dst), dtype=np.float32)
    if dst == 1:
        W[0, 0] = 1.0
        return W
    scale = (src - 1) / (dst - 1)
    for j in range(dst):
        pos = j * scale
        lo = int(np.floor(pos))
        hi = min(lo + 1, src - 1)
        frac = pos - lo
        W[lo, j] += 1.0 - frac
        W[hi, j] += frac
    return W


def _block_diag(w):
    """(V, Din, Dout) per-variable weights -> (V*Din, V*Dout) block-diagonal matrix."""
    V, Din, Dout = w.shape
    eye = jnp.eye(V, dtype=w.dtype)
    return jnp.einsum("vij,vw->viwj", w, eye).reshape(V * Din, V * Dout)


def _ln(x, gamma, beta):
    mean = jnp.mean(x, axis=-1, keepdims=True)
    c = x - mean
    var = jnp.mean(c * c, axis=-1, keepdims=True)
    return c * jax.lax.rsqrt(var + EPS) * gamma + beta


def _sigmoid(x):
    return 1.0 / (1.0 + jnp.exp(-x))


def _elu(x):
    return jnp.where(x > 0, x, jnp.exp(jnp.minimum(x, 0.0)) - 1.0)


def _vsn_kernel(
    xs_ref,
    bd_pre_ref, pre_b_ref,
    bd_interp_ref, rn_g_ref, rn_b_ref,
    bd_fc1_ref, fc1_b_ref,
    bd_fc2_ref, fc2_b_ref,
    bd_glu_ref, glu_b_ref,
    an_g_ref, an_b_ref,
    f_interp_ref, f_rn_g_ref, f_rn_b_ref,
    f_fc1_w_ref, f_fc1_b_ref,
    f_fc2_w_ref, f_fc2_b_ref,
    f_glu_w_ref, f_glu_b_ref,
    f_an_g_ref, f_an_b_ref,
    out_ref, w_ref,
):
    f32 = jnp.float32
    num_vars = xs_ref.shape[-1]
    hidden = out_ref.shape[-1]

    xs = xs_ref[...].astype(f32)                                   # (tile, V)

    # All V prescalers fused into one block-diagonal matmul: flattened embedding.
    flat = jnp.dot(xs, bd_pre_ref[...], preferred_element_type=f32) + pre_b_ref[...]

    # --- per-variable GRNs: every linear layer batched over V via block-diag MXU matmuls ---
    res_all = jnp.dot(flat, bd_interp_ref[...], preferred_element_type=f32)        # (tile, V*H)
    a_all = _elu(jnp.dot(flat, bd_fc1_ref[...], preferred_element_type=f32)
                 + fc1_b_ref[...])                                                  # (tile, V*Dh)
    a_all = jnp.dot(a_all, bd_fc2_ref[...], preferred_element_type=f32) + fc2_b_ref[...]
    g_all = jnp.dot(a_all, bd_glu_ref[...], preferred_element_type=f32) + glu_b_ref[...]  # (tile, V*2H)

    # --- flattened GRN -> softmax variable-selection weights ---
    fres = _ln(
        jnp.dot(flat, f_interp_ref[...], preferred_element_type=f32),
        f_rn_g_ref[...], f_rn_b_ref[...],
    )
    fa = _elu(jnp.dot(flat, f_fc1_w_ref[...], preferred_element_type=f32) + f_fc1_b_ref[...])
    fa = jnp.dot(fa, f_fc2_w_ref[...], preferred_element_type=f32) + f_fc2_b_ref[...]
    fg = jnp.dot(fa, f_glu_w_ref[...], preferred_element_type=f32) + f_glu_b_ref[...]
    fglu = fg[:, :num_vars] * _sigmoid(fg[:, num_vars:])
    logits = _ln(fglu + fres, f_an_g_ref[...], f_an_b_ref[...])

    m = jnp.max(logits, axis=-1, keepdims=True)
    e = jnp.exp(logits - m)
    w = e / jnp.sum(e, axis=-1, keepdims=True)

    # --- per-variable LayerNorms, GLU gating and weighted accumulation (no MXU work) ---
    rn_g = rn_g_ref[...]
    rn_b = rn_b_ref[...]
    an_g = an_g_ref[...]
    an_b = an_b_ref[...]

    acc = jnp.zeros((xs.shape[0], hidden), dtype=f32)
    for v in range(num_vars):
        lo, hi = v * hidden, (v + 1) * hidden
        res = _ln(res_all[:, lo:hi], rn_g[:, lo:hi], rn_b[:, lo:hi])
        val = g_all[:, 2 * v * hidden:(2 * v + 1) * hidden]
        gate = g_all[:, (2 * v + 1) * hidden:(2 * v + 2) * hidden]
        grn = _ln(val * _sigmoid(gate) + res, an_g[:, lo:hi], an_b[:, lo:hi])
        acc = acc + grn * w[:, v:v + 1]

    out_ref[...] = acc.astype(out_ref.dtype)
    w_ref[...] = w.astype(w_ref.dtype)


def variable_selection_network(x_dict, params, names, *, tile_n=DEFAULT_TILE_N):
    """x_dict[name]: (B, T, 1) continuous inputs. Returns (outputs (B,T,H), weights (B,T,1,V))."""
    p = params
    V = len(names)
    B, T, _ = x_dict[names[0]].shape
    N = B * T
    D = p["interp"].shape[0]
    H = p["interp"].shape[1]
    Dh = p["fc1_w"].shape[-1]
    HF = p["f_fc1_w"].shape[-1]
    F = V * D
    dtype = x_dict[names[0]].dtype

    # Stack the scalar continuous inputs: (N, V) — feature axis last (lanes).
    xs = jnp.concatenate([x_dict[n].reshape(N, 1) for n in names], axis=-1)

    # Fold all per-variable linear layers into block-diagonal matrices (built once,
    # resident in VMEM across row tiles).
    weights = [
        _block_diag(p["pre_w"][:, None, :]),                       # (V, V*D)   prescalers
        p["pre_b"].reshape(1, F),
        _block_diag(jnp.broadcast_to(p["interp"], (V, D, H))),     # (V*D, V*H) residual interp
        p["rn_g"].reshape(1, V * H), p["rn_b"].reshape(1, V * H),
        _block_diag(p["fc1_w"]), p["fc1_b"].reshape(1, V * Dh),    # (V*D, V*Dh)
        _block_diag(p["fc2_w"]), p["fc2_b"].reshape(1, V * Dh),    # (V*Dh, V*Dh)
        _block_diag(p["glu_w"]), p["glu_b"].reshape(1, V * 2 * H), # (V*Dh, V*2H)
        p["an_g"].reshape(1, V * H), p["an_b"].reshape(1, V * H),
        p["f_interp"], p["f_rn_g"], p["f_rn_b"],
        p["f_fc1_w"], p["f_fc1_b"],
        p["f_fc2_w"], p["f_fc2_b"],
        p["f_glu_w"], p["f_glu_b"],
        p["f_an_g"], p["f_an_b"],
    ]

    # Row tiling: multiple of 8 rows per tile; pad N so the grid divides evenly.
    tile = min(tile_n, _round_up(N, 8))
    n_pad = _round_up(N, tile)
    if n_pad != N:
        xs = jnp.pad(xs, ((0, n_pad - N), (0, 0)))
    grid = (n_pad // tile,)

    def _const_spec(arr):
        return pl.BlockSpec(arr.shape, lambda i: (0, 0))   # all weights are 2D

    in_specs = [pl.BlockSpec((tile, V), lambda i: (i, 0))]
    in_specs += [_const_spec(w) for w in weights]
    out_specs = [
        pl.BlockSpec((tile, H), lambda i: (i, 0)),
        pl.BlockSpec((tile, V), lambda i: (i, 0)),
    ]
    out_shape = (
        jax.ShapeDtypeStruct((n_pad, H), dtype),
        jax.ShapeDtypeStruct((n_pad, V), dtype),
    )

    # Advisory cost estimate for XLA's scheduler.
    flops_per_row = 2 * (
        V * F + F * V * H + F * V * Dh + (V * Dh) ** 2 + V * Dh * V * 2 * H
        + F * V + F * HF + HF * HF + HF * 2 * V
    ) + 16 * V * H
    trans_per_row = V * Dh + HF + V * H + 3 * V
    bytes_accessed = 4 * (
        n_pad * (2 * V + H) + sum(int(np.prod(w.shape)) for w in weights)
    )

    outs, w = pl.pallas_call(
        _vsn_kernel,
        out_shape=out_shape,
        grid=grid,
        in_specs=in_specs,
        out_specs=out_specs,
        compiler_params=pltpu.CompilerParams(
            dimension_semantics=("parallel",),   # independent row tiles -> megacore
        ),
        cost_estimate=pl.CostEstimate(
            flops=int(n_pad * flops_per_row),
            transcendentals=int(n_pad * trans_per_row),
            bytes_accessed=int(bytes_accessed),
        ),
    )(xs, *weights)

    outputs = outs[:N].reshape(B, T, H)
    sparse_weights = w[:N].reshape(B, T, 1, V)
    return outputs, sparse_weights


def make_params(key, num_vars, var_size, hidden_size):
    V, D, H = num_vars, var_size, hidden_size
    F = V * D
    Dh = min(D, H)     # per-variable GRN hidden = min(inputSize, hiddenSize)
    HF = min(H, V)     # flattened GRN hidden = min(hiddenSize, numVars)
    ks = jax.random.split(key, 22)
    rnd = lambda k, shape, s=0.3: s * jax.random.normal(k, shape, dtype=jnp.float32)
    return dict(
        pre_w=rnd(ks[0], (V, D)),
        pre_b=rnd(ks[1], (V, D), 0.1),
        interp=jnp.asarray(_interp_matrix(D, H)),
        rn_g=1.0 + 0.1 * jax.random.normal(ks[2], (V, H), dtype=jnp.float32),
        rn_b=rnd(ks[3], (V, H), 0.1),
        fc1_w=rnd(ks[4], (V, D, Dh)),
        fc1_b=rnd(ks[5], (V, Dh), 0.1),
        fc2_w=rnd(ks[6], (V, Dh, Dh)),
        fc2_b=rnd(ks[7], (V, Dh), 0.1),
        glu_w=rnd(ks[8], (V, Dh, 2 * H)),
        glu_b=rnd(ks[9], (V, 2 * H), 0.1),
        an_g=1.0 + 0.1 * jax.random.normal(ks[10], (V, H), dtype=jnp.float32),
        an_b=rnd(ks[11], (V, H), 0.1),
        f_interp=jnp.asarray(_interp_matrix(F, V)),
        f_rn_g=1.0 + 0.1 * jax.random.normal(ks[12], (1, V), dtype=jnp.float32),
        f_rn_b=rnd(ks[13], (1, V), 0.1),
        f_fc1_w=rnd(ks[14], (F, HF)),
        f_fc1_b=rnd(ks[15], (1, HF), 0.1),
        f_fc2_w=rnd(ks[16], (HF, HF)),
        f_fc2_b=rnd(ks[17], (1, HF), 0.1),
        f_glu_w=rnd(ks[18], (HF, 2 * V)),
        f_glu_b=rnd(ks[19], (1, 2 * V), 0.1),
        f_an_g=1.0 + 0.1 * jax.random.normal(ks[20], (1, V), dtype=jnp.float32),
        f_an_b=rnd(ks[21], (1, V), 0.1),
    )


def _reference(x_dict, params, names):
    """Pure-JAX mirror of the PyTorch variableSelectionNetwork forward (eval mode)."""
    p = params
    V = len(names)
    B, T, _ = x_dict[names[0]].shape
    H = p["interp"].shape[1]
    xs = jnp.concatenate([x_dict[n].reshape(-1, 1) for n in names], axis=-1)  # (N, V)

    def ln(x, g, b):
        m = x.mean(-1, keepdims=True)
        v = ((x - m) ** 2).mean(-1, keepdims=True)
        return (x - m) / jnp.sqrt(v + EPS) * g + b

    embs, grn_outs = [], []
    for v in range(V):
        emb = xs[:, v:v + 1] * p["pre_w"][v] + p["pre_b"][v]
        embs.append(emb)
        res = ln(emb @ p["interp"], p["rn_g"][v], p["rn_b"][v])
        a = jax.nn.elu(emb @ p["fc1_w"][v] + p["fc1_b"][v])
        a = a @ p["fc2_w"][v] + p["fc2_b"][v]
        g = a @ p["glu_w"][v] + p["glu_b"][v]
        glu = g[:, :H] * jax.nn.sigmoid(g[:, H:])
        grn_outs.append(ln(glu + res, p["an_g"][v], p["an_b"][v]))

    flat = jnp.concatenate(embs, axis=-1)
    fres = ln(flat @ p["f_interp"], p["f_rn_g"][0], p["f_rn_b"][0])
    fa = jax.nn.elu(flat @ p["f_fc1_w"] + p["f_fc1_b"][0])
    fa = fa @ p["f_fc2_w"] + p["f_fc2_b"][0]
    fg = fa @ p["f_glu_w"] + p["f_glu_b"][0]
    fglu = fg[:, :V] * jax.nn.sigmoid(fg[:, V:])
    weights = jax.nn.softmax(ln(fglu + fres, p["f_an_g"][0], p["f_an_b"][0]), axis=-1)

    stacked = jnp.stack(grn_outs, axis=-1)           # (N, H, V)
    out = (stacked * weights[:, None, :]).sum(-1)    # (N, H)
    return out.reshape(B, T, H), weights.reshape(B, T, 1, V)


if __name__ == "__main__":
    B, T = 2, 8
    num_vars, var_size, hidden_size = 3, 4, 32
    names = [f"var{i}" for i in range(num_vars)]

    key = jax.random.PRNGKey(0)
    kp, kx = jax.random.split(key)
    params = make_params(kp, num_vars, var_size, hidden_size)

    xkeys = jax.random.split(kx, num_vars)
    x_dict = {
        n: jax.random.normal(xkeys[i], (B, T, 1), dtype=jnp.float32)
        for i, n in enumerate(names)
    }

    out, sw = variable_selection_network(x_dict, params, names)
    out, sw = jax.block_until_ready((out, sw))

    ref_out, ref_sw = _reference(x_dict, params, names)
    np.testing.assert_allclose(np.asarray(out), np.asarray(ref_out), rtol=1e-4, atol=1e-4)
    np.testing.assert_allclose(np.asarray(sw), np.asarray(ref_sw), rtol=1e-4, atol=1e-4)

    print("KERNEL_OK")
</pallas_src>

<mosaic_0001>
module attributes {stable_mosaic.version = 11 : i64} {
  func.func @_vsn_kernel(%arg0: i32, %arg1: memref<16x3xf32, #tpu.memory_space<vmem>>, %arg2: memref<3x12xf32, #tpu.memory_space<vmem>>, %arg3: memref<1x12xf32, #tpu.memory_space<vmem>>, %arg4: memref<12x96xf32, #tpu.memory_space<vmem>>, %arg5: memref<1x96xf32, #tpu.memory_space<vmem>>, %arg6: memref<1x96xf32, #tpu.memory_space<vmem>>, %arg7: memref<12x12xf32, #tpu.memory_space<vmem>>, %arg8: memref<1x12xf32, #tpu.memory_space<vmem>>, %arg9: memref<12x12xf32, #tpu.memory_space<vmem>>, %arg10: memref<1x12xf32, #tpu.memory_space<vmem>>, %arg11: memref<12x192xf32, #tpu.memory_space<vmem>>, %arg12: memref<1x192xf32, #tpu.memory_space<vmem>>, %arg13: memref<1x96xf32, #tpu.memory_space<vmem>>, %arg14: memref<1x96xf32, #tpu.memory_space<vmem>>, %arg15: memref<12x3xf32, #tpu.memory_space<vmem>>, %arg16: memref<1x3xf32, #tpu.memory_space<vmem>>, %arg17: memref<1x3xf32, #tpu.memory_space<vmem>>, %arg18: memref<12x3xf32, #tpu.memory_space<vmem>>, %arg19: memref<1x3xf32, #tpu.memory_space<vmem>>, %arg20: memref<3x3xf32, #tpu.memory_space<vmem>>, %arg21: memref<1x3xf32, #tpu.memory_space<vmem>>, %arg22: memref<3x6xf32, #tpu.memory_space<vmem>>, %arg23: memref<1x6xf32, #tpu.memory_space<vmem>>, %arg24: memref<1x3xf32, #tpu.memory_space<vmem>>, %arg25: memref<1x3xf32, #tpu.memory_space<vmem>>, %arg26: memref<16x32xf32, #tpu.memory_space<vmem>>, %arg27: memref<16x3xf32, #tpu.memory_space<vmem>>) attributes {dimension_semantics = [#tpu.dimension_semantics<parallel>], iteration_bounds = array<i64: 1>, scalar_prefetch = 0 : i64, scratch_operands = 0 : i64, tpu.core_type = #tpu.core_type<tc>, window_params = [{transform_indices = @transform_0, window_bounds = array<i64: 16, 3>}, {pipeline_mode = #tpu.pipeline_mode<synchronous>, transform_indices = @transform_1, window_bounds = array<i64: 3, 12>}, {pipeline_mode = #tpu.pipeline_mode<synchronous>, transform_indices = @transform_2, window_bounds = array<i64: 1, 12>}, {pipeline_mode = #tpu.pipeline_mode<synchronous>, transform_indices = @transform_3, window_bounds = array<i64: 12, 96>}, {pipeline_mode = #tpu.pipeline_mode<synchronous>, transform_indices = @transform_4, window_bounds = array<i64: 1, 96>}, {pipeline_mode = #tpu.pipeline_mode<synchronous>, transform_indices = @transform_5, window_bounds = array<i64: 1, 96>}, {pipeline_mode = #tpu.pipeline_mode<synchronous>, transform_indices = @transform_6, window_bounds = array<i64: 12, 12>}, {pipeline_mode = #tpu.pipeline_mode<synchronous>, transform_indices = @transform_7, window_bounds = array<i64: 1, 12>}, {pipeline_mode = #tpu.pipeline_mode<synchronous>, transform_indices = @transform_8, window_bounds = array<i64: 12, 12>}, {pipeline_mode = #tpu.pipeline_mode<synchronous>, transform_indices = @transform_9, window_bounds = array<i64: 1, 12>}, {pipeline_mode = #tpu.pipeline_mode<synchronous>, transform_indices = @transform_10, window_bounds = array<i64: 12, 192>}, {pipeline_mode = #tpu.pipeline_mode<synchronous>, transform_indices = @transform_11, window_bounds = array<i64: 1, 192>}, {pipeline_mode = #tpu.pipeline_mode<synchronous>, transform_indices = @transform_12, window_bounds = array<i64: 1, 96>}, {pipeline_mode = #tpu.pipeline_mode<synchronous>, transform_indices = @transform_13, window_bounds = array<i64: 1, 96>}, {pipeline_mode = #tpu.pipeline_mode<synchronous>, transform_indices = @transform_14, window_bounds = array<i64: 12, 3>}, {pipeline_mode = #tpu.pipeline_mode<synchronous>, transform_indices = @transform_15, window_bounds = array<i64: 1, 3>}, {pipeline_mode = #tpu.pipeline_mode<synchronous>, transform_indices = @transform_16, window_bounds = array<i64: 1, 3>}, {pipeline_mode = #tpu.pipeline_mode<synchronous>, transform_indices = @transform_17, window_bounds = array<i64: 12, 3>}, {pipeline_mode = #tpu.pipeline_mode<synchronous>, transform_indices = @transform_18, window_bounds = array<i64: 1, 3>}, {pipeline_mode = #tpu.pipeline_mode<synchronous>, transform_indices = @transform_19, window_bounds = array<i64: 3, 3>}, {pipeline_mode = #tpu.pipeline_mode<synchronous>, transform_indices = @transform_20, window_bounds = array<i64: 1, 3>}, {pipeline_mode = #tpu.pipeline_mode<synchronous>, transform_indices = @transform_21, window_bounds = array<i64: 3, 6>}, {pipeline_mode = #tpu.pipeline_mode<synchronous>, transform_indices = @transform_22, window_bounds = array<i64: 1, 6>}, {pipeline_mode = #tpu.pipeline_mode<synchronous>, transform_indices = @transform_23, window_bounds = array<i64: 1, 3>}, {pipeline_mode = #tpu.pipeline_mode<synchronous>, transform_indices = @transform_24, window_bounds = array<i64: 1, 3>}, {transform_indices = @transform_25, window_bounds = array<i64: 16, 32>}, {transform_indices = @transform_26, window_bounds = array<i64: 16, 3>}]} {
    %c0 = arith.constant 0 : index
    %c0_0 = arith.constant 0 : index
    %0 = vector.load %arg1[%c0, %c0_0] : memref<16x3xf32, #tpu.memory_space<vmem>>, vector<16x3xf32>
    %c0_1 = arith.constant 0 : index
    %c0_2 = arith.constant 0 : index
    %1 = vector.load %arg2[%c0_1, %c0_2] : memref<3x12xf32, #tpu.memory_space<vmem>>, vector<3x12xf32>
    %cst = arith.constant dense<0.000000e+00> : vector<16x12xf32>
    %2 = tpu.matmul %0, %1, %cst {dimension_numbers = #tpu.dot_dimension_numbers<[1], [0], [0], [1], [0, 0, 1, 1], [], []>} : vector<16x3xf32>, vector<3x12xf32>, vector<16x12xf32> -> vector<16x12xf32>
    %c0_3 = arith.constant 0 : index
    %c0_4 = arith.constant 0 : index
    %3 = vector.load %arg3[%c0_3, %c0_4] : memref<1x12xf32, #tpu.memory_space<vmem>>, vector<1x12xf32>
    %4 = vector.broadcast %3 : vector<1x12xf32> to vector<16x12xf32>
    %5 = arith.addf %2, %4 : vector<16x12xf32>
    %c0_5 = arith.constant 0 : index
    %c0_6 = arith.constant 0 : index
    %6 = vector.load %arg4[%c0_5, %c0_6] : memref<12x96xf32, #tpu.memory_space<vmem>>, vector<12x96xf32>
    %cst_7 = arith.constant dense<0.000000e+00> : vector<16x96xf32>
    %7 = tpu.matmul %5, %6, %cst_7 {dimension_numbers = #tpu.dot_dimension_numbers<[1], [0], [0], [1], [0, 0, 1, 1], [], []>} : vector<16x12xf32>, vector<12x96xf32>, vector<16x96xf32> -> vector<16x96xf32>
    %c0_8 = arith.constant 0 : index
    %c0_9 = arith.constant 0 : index
    %8 = vector.load %arg7[%c0_8, %c0_9] : memref<12x12xf32, #tpu.memory_space<vmem>>, vector<12x12xf32>
    %cst_10 = arith.constant dense<0.000000e+00> : vector<16x12xf32>
    %9 = tpu.matmul %5, %8, %cst_10 {dimension_numbers = #tpu.dot_dimension_numbers<[1], [0], [0], [1], [0, 0, 1, 1], [], []>} : vector<16x12xf32>, vector<12x12xf32>, vector<16x12xf32> -> vector<16x12xf32>
    %c0_11 = arith.constant 0 : index
    %c0_12 = arith.constant 0 : index
    %10 = vector.load %arg8[%c0_11, %c0_12] : memref<1x12xf32, #tpu.memory_space<vmem>>, vector<1x12xf32>
    %11 = vector.broadcast %10 : vector<1x12xf32> to vector<16x12xf32>
    %12 = arith.addf %9, %11 : vector<16x12xf32>
    %cst_13 = arith.constant 0.000000e+00 : f32
    %13 = vector.broadcast %cst_13 : f32 to vector<16x12xf32>
    %14 = arith.cmpf ogt, %12, %13 : vector<16x12xf32>
    %cst_14 = arith.constant 0.000000e+00 : f32
    %15 = vector.broadcast %cst_14 : f32 to vector<16x12xf32>
    %16 = arith.minimumf %12, %15 : vector<16x12xf32>
    %17 = math.exp %16 : vector<16x12xf32>
    %cst_15 = arith.constant 1.000000e+00 : f32
    %18 = vector.broadcast %cst_15 : f32 to vector<16x12xf32>
    %19 = arith.subf %17, %18 : vector<16x12xf32>
    %20 = arith.select %14, %12, %19 : vector<16x12xi1>, vector<16x12xf32>
    %c0_16 = arith.constant 0 : index
    %c0_17 = arith.constant 0 : index
    %21 = vector.load %arg9[%c0_16, %c0_17] : memref<12x12xf32, #tpu.memory_space<vmem>>, vector<12x12xf32>
    %cst_18 = arith.constant dense<0.000000e+00> : vector<16x12xf32>
    %22 = tpu.matmul %20, %21, %cst_18 {dimension_numbers = #tpu.dot_dimension_numbers<[1], [0], [0], [1], [0, 0, 1, 1], [], []>} : vector<16x12xf32>, vector<12x12xf32>, vector<16x12xf32> -> vector<16x12xf32>
    %c0_19 = arith.constant 0 : index
    %c0_20 = arith.constant 0 : index
    %23 = vector.load %arg10[%c0_19, %c0_20] : memref<1x12xf32, #tpu.memory_space<vmem>>, vector<1x12xf32>
    %24 = vector.broadcast %23 : vector<1x12xf32> to vector<16x12xf32>
    %25 = arith.addf %22, %24 : vector<16x12xf32>
    %c0_21 = arith.constant 0 : index
    %c0_22 = arith.constant 0 : index
    %26 = vector.load %arg11[%c0_21, %c0_22] : memref<12x192xf32, #tpu.memory_space<vmem>>, vector<12x192xf32>
    %cst_23 = arith.constant dense<0.000000e+00> : vector<16x192xf32>
    %27 = tpu.matmul %25, %26, %cst_23 {dimension_numbers = #tpu.dot_dimension_numbers<[1], [0], [0], [1], [0, 0, 1, 1], [], []>} : vector<16x12xf32>, vector<12x192xf32>, vector<16x192xf32> -> vector<16x192xf32>
    %c0_24 = arith.constant 0 : index
    %c0_25 = arith.constant 0 : index
    %28 = vector.load %arg12[%c0_24, %c0_25] : memref<1x192xf32, #tpu.memory_space<vmem>>, vector<1x192xf32>
    %29 = vector.broadcast %28 : vector<1x192xf32> to vector<16x192xf32>
    %30 = arith.addf %27, %29 : vector<16x192xf32>
    %c0_26 = arith.constant 0 : index
    %c0_27 = arith.constant 0 : index
    %31 = vector.load %arg15[%c0_26, %c0_27] : memref<12x3xf32, #tpu.memory_space<vmem>>, vector<12x3xf32>
    %cst_28 = arith.constant dense<0.000000e+00> : vector<16x3xf32>
    %32 = tpu.matmul %5, %31, %cst_28 {dimension_numbers = #tpu.dot_dimension_numbers<[1], [0], [0], [1], [0, 0, 1, 1], [], []>} : vector<16x12xf32>, vector<12x3xf32>, vector<16x3xf32> -> vector<16x3xf32>
    %c0_29 = arith.constant 0 : index
    %c0_30 = arith.constant 0 : index
    %33 = vector.load %arg16[%c0_29, %c0_30] : memref<1x3xf32, #tpu.memory_space<vmem>>, vector<1x3xf32>
    %c0_31 = arith.constant 0 : index
    %c0_32 = arith.constant 0 : index
    %34 = vector.load %arg17[%c0_31, %c0_32] : memref<1x3xf32, #tpu.memory_space<vmem>>, vector<1x3xf32>
    %cst_33 = arith.constant dense<0.000000e+00> : vector<16xf32>
    %35 = vector.multi_reduction <add>, %32, %cst_33 [1] : vector<16x3xf32> to vector<16xf32>
    %36 = vector.shape_cast %35 : vector<16xf32> to vector<16x1xf32>
    %cst_34 = arith.constant 3.000000e+00 : f32
    %37 = vector.broadcast %cst_34 : f32 to vector<16x1xf32>
    %38 = arith.divf %36, %37 : vector<16x1xf32>
    %39 = vector.broadcast %38 : vector<16x1xf32> to vector<16x3xf32>
    %40 = arith.subf %32, %39 : vector<16x3xf32>
    %41 = arith.mulf %40, %40 : vector<16x3xf32>
    %cst_35 = arith.constant dense<0.000000e+00> : vector<16xf32>
    %42 = vector.multi_reduction <add>, %41, %cst_35 [1] : vector<16x3xf32> to vector<16xf32>
    %43 = vector.shape_cast %42 : vector<16xf32> to vector<16x1xf32>
    %cst_36 = arith.constant 3.000000e+00 : f32
    %44 = vector.broadcast %cst_36 : f32 to vector<16x1xf32>
    %45 = arith.divf %43, %44 : vector<16x1xf32>
    %cst_37 = arith.constant 9.99999974E-6 : f32
    %46 = vector.broadcast %cst_37 : f32 to vector<16x1xf32>
    %47 = arith.addf %45, %46 : vector<16x1xf32>
    %48 = math.rsqrt %47 : vector<16x1xf32>
    %49 = vector.broadcast %48 : vector<16x1xf32> to vector<16x3xf32>
    %50 = arith.mulf %40, %49 : vector<16x3xf32>
    %51 = vector.broadcast %33 : vector<1x3xf32> to vector<16x3xf32>
    %52 = arith.mulf %50, %51 : vector<16x3xf32>
    %53 = vector.broadcast %34 : vector<1x3xf32> to vector<16x3xf32>
    %54 = arith.addf %52, %53 : vector<16x3xf32>
    %c0_38 = arith.constant 0 : index
    %c0_39 = arith.constant 0 : index
    %55 = vector.load %arg18[%c0_38, %c0_39] : memref<12x3xf32, #tpu.memory_space<vmem>>, vector<12x3xf32>
    %cst_40 = arith.constant dense<0.000000e+00> : vector<16x3xf32>
    %56 = tpu.matmul %5, %55, %cst_40 {dimension_numbers = #tpu.dot_dimension_numbers<[1], [0], [0], [1], [0, 0, 1, 1], [], []>} : vector<16x12xf32>, vector<12x3xf32>, vector<16x3xf32> -> vector<16x3xf32>
    %c0_41 = arith.constant 0 : index
    %c0_42 = arith.constant 0 : index
    %57 = vector.load %arg19[%c0_41, %c0_42] : memref<1x3xf32, #tpu.memory_space<vmem>>, vector<1x3xf32>
    %58 = vector.broadcast %57 : vector<1x3xf32> to vector<16x3xf32>
    %59 = arith.addf %56, %58 : vector<16x3xf32>
    %cst_43 = arith.constant 0.000000e+00 : f32
    %60 = vector.broadcast %cst_43 : f32 to vector<16x3xf32>
    %61 = arith.cmpf ogt, %59, %60 : vector<16x3xf32>
    %cst_44 = arith.constant 0.000000e+00 : f32
    %62 = vector.broadcast %cst_44 : f32 to vector<16x3xf32>
    %63 = arith.minimumf %59, %62 : vector<16x3xf32>
    %64 = math.exp %63 : vector<16x3xf32>
    %cst_45 = arith.constant 1.000000e+00 : f32
    %65 = vector.broadcast %cst_45 : f32 to vector<16x3xf32>
    %66 = arith.subf %64, %65 : vector<16x3xf32>
    %67 = arith.select %61, %59, %66 : vector<16x3xi1>, vector<16x3xf32>
    %c0_46 = arith.constant 0 : index
    %c0_47 = arith.constant 0 : index
    %68 = vector.load %arg20[%c0_46, %c0_47] : memref<3x3xf32, #tpu.memory_space<vmem>>, vector<3x3xf32>
    %cst_48 = arith.constant dense<0.000000e+00> : vector<16x3xf32>
    %69 = tpu.matmul %67, %68, %cst_48 {dimension_numbers = #tpu.dot_dimension_numbers<[1], [0], [0], [1], [0, 0, 1, 1], [], []>} : vector<16x3xf32>, vector<3x3xf32>, vector<16x3xf32> -> vector<16x3xf32>
    %c0_49 = arith.constant 0 : index
    %c0_50 = arith.constant 0 : index
    %70 = vector.load %arg21[%c0_49, %c0_50] : memref<1x3xf32, #tpu.memory_space<vmem>>, vector<1x3xf32>
    %71 = vector.broadcast %70 : vector<1x3xf32> to vector<16x3xf32>
    %72 = arith.addf %69, %71 : vector<16x3xf32>
    %c0_51 = arith.constant 0 : index
    %c0_52 = arith.constant 0 : index
    %73 = vector.load %arg22[%c0_51, %c0_52] : memref<3x6xf32, #tpu.memory_space<vmem>>, vector<3x6xf32>
    %cst_53 = arith.constant dense<0.000000e+00> : vector<16x6xf32>
    %74 = tpu.matmul %72, %73, %cst_53 {dimension_numbers = #tpu.dot_dimension_numbers<[1], [0], [0], [1], [0, 0, 1, 1], [], []>} : vector<16x3xf32>, vector<3x6xf32>, vector<16x6xf32> -> vector<16x6xf32>
    %c0_54 = arith.constant 0 : index
    %c0_55 = arith.constant 0 : index
    %75 = vector.load %arg23[%c0_54, %c0_55] : memref<1x6xf32, #tpu.memory_space<vmem>>, vector<1x6xf32>
    %76 = vector.broadcast %75 : vector<1x6xf32> to vector<16x6xf32>
    %77 = arith.addf %74, %76 : vector<16x6xf32>
    %78 = vector.extract_strided_slice %77 {offsets = [0, 0], sizes = [16, 3], strides = [1, 1]} : vector<16x6xf32> to vector<16x3xf32>
    %79 = vector.extract_strided_slice %77 {offsets = [0, 3], sizes = [16, 3], strides = [1, 1]} : vector<16x6xf32> to vector<16x3xf32>
    %cst_56 = arith.constant 0.000000e+00 : f32
    %80 = vector.broadcast %cst_56 : f32 to vector<16x3xf32>
    %81 = arith.subf %80, %79 : vector<16x3xf32>
    %82 = math.exp %81 : vector<16x3xf32>
    %cst_57 = arith.constant 1.000000e+00 : f32
    %83 = vector.broadcast %cst_57 : f32 to vector<16x3xf32>
    %84 = arith.addf %83, %82 : vector<16x3xf32>
    %cst_58 = arith.constant 1.000000e+00 : f32
    %85 = vector.broadcast %cst_58 : f32 to vector<16x3xf32>
    %86 = arith.divf %85, %84 : vector<16x3xf32>
    %87 = arith.mulf %78, %86 : vector<16x3xf32>
    %88 = arith.addf %87, %54 : vector<16x3xf32>
    %c0_59 = arith.constant 0 : index
    %c0_60 = arith.constant 0 : index
    %89 = vector.load %arg24[%c0_59, %c0_60] : memref<1x3xf32, #tpu.memory_space<vmem>>, vector<1x3xf32>
    %c0_61 = arith.constant 0 : index
    %c0_62 = arith.constant 0 : index
    %90 = vector.load %arg25[%c0_61, %c0_62] : memref<1x3xf32, #tpu.memory_space<vmem>>, vector<1x3xf32>
    %cst_63 = arith.constant dense<0.000000e+00> : vector<16xf32>
    %91 = vector.multi_reduction <add>, %88, %cst_63 [1] : vector<16x3xf32> to vector<16xf32>
    %92 = vector.shape_cast %91 : vector<16xf32> to vector<16x1xf32>
    %cst_64 = arith.constant 3.000000e+00 : f32
    %93 = vector.broadcast %cst_64 : f32 to vector<16x1xf32>
    %94 = arith.divf %92, %93 : vector<16x1xf32>
    %95 = vector.broadcast %94 : vector<16x1xf32> to vector<16x3xf32>
    %96 = arith.subf %88, %95 : vector<16x3xf32>
    %97 = arith.mulf %96, %96 : vector<16x3xf32>
    %cst_65 = arith.constant dense<0.000000e+00> : vector<16xf32>
    %98 = vector.multi_reduction <add>, %97, %cst_65 [1] : vector<16x3xf32> to vector<16xf32>
    %99 = vector.shape_cast %98 : vector<16xf32> to vector<16x1xf32>
    %cst_66 = arith.constant 3.000000e+00 : f32
    %100 = vector.broadcast %cst_66 : f32 to vector<16x1xf32>
    %101 = arith.divf %99, %100 : vector<16x1xf32>
    %cst_67 = arith.constant 9.99999974E-6 : f32
    %102 = vector.broadcast %cst_67 : f32 to vector<16x1xf32>
    %103 = arith.addf %101, %102 : vector<16x1xf32>
    %104 = math.rsqrt %103 : vector<16x1xf32>
    %105 = vector.broadcast %104 : vector<16x1xf32> to vector<16x3xf32>
    %106 = arith.mulf %96, %105 : vector<16x3xf32>
    %107 = vector.broadcast %89 : vector<1x3xf32> to vector<16x3xf32>
    %108 = arith.mulf %106, %107 : vector<16x3xf32>
    %109 = vector.broadcast %90 : vector<1x3xf32> to vector<16x3xf32>
    %110 = arith.addf %108, %109 : vector<16x3xf32>
    %cst_68 = arith.constant dense<0xFF800000> : vector<16xf32>
    %111 = vector.multi_reduction <maximumf>, %110, %cst_68 [1] : vector<16x3xf32> to vector<16xf32>
    %112 = vector.shape_cast %111 : vector<16xf32> to vector<16x1xf32>
    %113 = vector.broadcast %112 : vector<16x1xf32> to vector<16x3xf32>
    %114 = arith.subf %110, %113 : vector<16x3xf32>
    %115 = math.exp %114 : vector<16x3xf32>
    %cst_69 = arith.constant dense<0.000000e+00> : vector<16xf32>
    %116 = vector.multi_reduction <add>, %115, %cst_69 [1] : vector<16x3xf32> to vector<16xf32>
    %117 = vector.shape_cast %116 : vector<16xf32> to vector<16x1xf32>
    %118 = vector.broadcast %117 : vector<16x1xf32> to vector<16x3xf32>
    %119 = arith.divf %115, %118 : vector<16x3xf32>
    %c0_70 = arith.constant 0 : index
    %c0_71 = arith.constant 0 : index
    %120 = vector.load %arg5[%c0_70, %c0_71] : memref<1x96xf32, #tpu.memory_space<vmem>>, vector<1x96xf32>
    %c0_72 = arith.constant 0 : index
    %c0_73 = arith.constant 0 : index
    %121 = vector.load %arg6[%c0_72, %c0_73] : memref<1x96xf32, #tpu.memory_space<vmem>>, vector<1x96xf32>
    %c0_74 = arith.constant 0 : index
    %c0_75 = arith.constant 0 : index
    %122 = vector.load %arg13[%c0_74, %c0_75] : memref<1x96xf32, #tpu.memory_space<vmem>>, vector<1x96xf32>
    %c0_76 = arith.constant 0 : index
    %c0_77 = arith.constant 0 : index
    %123 = vector.load %arg14[%c0_76, %c0_77] : memref<1x96xf32, #tpu.memory_space<vmem>>, vector<1x96xf32>
    %cst_78 = arith.constant 0.000000e+00 : f32
    %124 = vector.broadcast %cst_78 : f32 to vector<16x32xf32>
    %125 = vector.extract_strided_slice %7 {offsets = [0, 0], sizes = [16, 32], strides = [1, 1]} : vector<16x96xf32> to vector<16x32xf32>
    %126 = vector.extract_strided_slice %120 {offsets = [0, 0], sizes = [1, 32], strides = [1, 1]} : vector<1x96xf32> to vector<1x32xf32>
    %127 = vector.extract_strided_slice %121 {offsets = [0, 0], sizes = [1, 32], strides = [1, 1]} : vector<1x96xf32> to vector<1x32xf32>
    %cst_79 = arith.constant dense<0.000000e+00> : vector<16xf32>
    %128 = vector.multi_reduction <add>, %125, %cst_79 [1] : vector<16x32xf32> to vector<16xf32>
    %129 = vector.shape_cast %128 : vector<16xf32> to vector<16x1xf32>
    %cst_80 = arith.constant 3.200000e+01 : f32
    %130 = vector.broadcast %cst_80 : f32 to vector<16x1xf32>
    %131 = arith.divf %129, %130 : vector<16x1xf32>
    %132 = vector.broadcast %131 : vector<16x1xf32> to vector<16x32xf32>
    %133 = arith.subf %125, %132 : vector<16x32xf32>
    %134 = arith.mulf %133, %133 : vector<16x32xf32>
    %cst_81 = arith.constant dense<0.000000e+00> : vector<16xf32>
    %135 = vector.multi_reduction <add>, %134, %cst_81 [1] : vector<16x32xf32> to vector<16xf32>
    %136 = vector.shape_cast %135 : vector<16xf32> to vector<16x1xf32>
    %cst_82 = arith.constant 3.200000e+01 : f32
    %137 = vector.broadcast %cst_82 : f32 to vector<16x1xf32>
    %138 = arith.divf %136, %137 : vector<16x1xf32>
    %cst_83 = arith.constant 9.99999974E-6 : f32
    %139 = vector.broadcast %cst_83 : f32 to vector<16x1xf32>
    %140 = arith.addf %138, %139 : vector<16x1xf32>
    %141 = math.rsqrt %140 : vector<16x1xf32>
    %142 = vector.broadcast %141 : vector<16x1xf32> to vector<16x32xf32>
    %143 = arith.mulf %133, %142 : vector<16x32xf32>
    %144 = vector.broadcast %126 : vector<1x32xf32> to vector<16x32xf32>
    %145 = arith.mulf %143, %144 : vector<16x32xf32>
    %146 = vector.broadcast %127 : vector<1x32xf32> to vector<16x32xf32>
    %147 = arith.addf %145, %146 : vector<16x32xf32>
    %148 = vector.extract_strided_slice %30 {offsets = [0, 0], sizes = [16, 32], strides = [1, 1]} : vector<16x192xf32> to vector<16x32xf32>
    %149 = vector.extract_strided_slice %30 {offsets = [0, 32], sizes = [16, 32], strides = [1, 1]} : vector<16x192xf32> to vector<16x32xf32>
    %cst_84 = arith.constant 0.000000e+00 : f32
    %150 = vector.broadcast %cst_84 : f32 to vector<16x32xf32>
    %151 = arith.subf %150, %149 : vector<16x32xf32>
    %152 = math.exp %151 : vector<16x32xf32>
    %cst_85 = arith.constant 1.000000e+00 : f32
    %153 = vector.broadcast %cst_85 : f32 to vector<16x32xf32>
    %154 = arith.addf %153, %152 : vector<16x32xf32>
    %cst_86 = arith.constant 1.000000e+00 : f32
    %155 = vector.broadcast %cst_86 : f32 to vector<16x32xf32>
    %156 = arith.divf %155, %154 : vector<16x32xf32>
    %157 = arith.mulf %148, %156 : vector<16x32xf32>
    %158 = arith.addf %157, %147 : vector<16x32xf32>
    %159 = vector.extract_strided_slice %122 {offsets = [0, 0], sizes = [1, 32], strides = [1, 1]} : vector<1x96xf32> to vector<1x32xf32>
    %160 = vector.extract_strided_slice %123 {offsets = [0, 0], sizes = [1, 32], strides = [1, 1]} : vector<1x96xf32> to vector<1x32xf32>
    %cst_87 = arith.constant dense<0.000000e+00> : vector<16xf32>
    %161 = vector.multi_reduction <add>, %158, %cst_87 [1] : vector<16x32xf32> to vector<16xf32>
    %162 = vector.shape_cast %161 : vector<16xf32> to vector<16x1xf32>
    %cst_88 = arith.constant 3.200000e+01 : f32
    %163 = vector.broadcast %cst_88 : f32 to vector<16x1xf32>
    %164 = arith.divf %162, %163 : vector<16x1xf32>
    %165 = vector.broadcast %164 : vector<16x1xf32> to vector<16x32xf32>
    %166 = arith.subf %158, %165 : vector<16x32xf32>
    %167 = arith.mulf %166, %166 : vector<16x32xf32>
    %cst_89 = arith.constant dense<0.000000e+00> : vector<16xf32>
    %168 = vector.multi_reduction <add>, %167, %cst_89 [1] : vector<16x32xf32> to vector<16xf32>
    %169 = vector.shape_cast %168 : vector<16xf32> to vector<16x1xf32>
    %cst_90 = arith.constant 3.200000e+01 : f32
    %170 = vector.broadcast %cst_90 : f32 to vector<16x1xf32>
    %171 = arith.divf %169, %170 : vector<16x1xf32>
    %cst_91 = arith.constant 9.99999974E-6 : f32
    %172 = vector.broadcast %cst_91 : f32 to vector<16x1xf32>
    %173 = arith.addf %171, %172 : vector<16x1xf32>
    %174 = math.rsqrt %173 : vector<16x1xf32>
    %175 = vector.broadcast %174 : vector<16x1xf32> to vector<16x32xf32>
    %176 = arith.mulf %166, %175 : vector<16x32xf32>
    %177 = vector.broadcast %159 : vector<1x32xf32> to vector<16x32xf32>
    %178 = arith.mulf %176, %177 : vector<16x32xf32>
    %179 = vector.broadcast %160 : vector<1x32xf32> to vector<16x32xf32>
    %180 = arith.addf %178, %179 : vector<16x32xf32>
    %181 = vector.extract_strided_slice %119 {offsets = [0, 0], sizes = [16, 1], strides = [1, 1]} : vector<16x3xf32> to vector<16x1xf32>
    %182 = vector.broadcast %181 : vector<16x1xf32> to vector<16x32xf32>
    %183 = arith.mulf %180, %182 : vector<16x32xf32>
    %184 = arith.addf %124, %183 : vector<16x32xf32>
    %185 = vector.extract_strided_slice %7 {offsets = [0, 32], sizes = [16, 32], strides = [1, 1]} : vector<16x96xf32> to vector<16x32xf32>
    %186 = vector.extract_strided_slice %120 {offsets = [0, 32], sizes = [1, 32], strides = [1, 1]} : vector<1x96xf32> to vector<1x32xf32>
    %187 = vector.extract_strided_slice %121 {offsets = [0, 32], sizes = [1, 32], strides = [1, 1]} : vector<1x96xf32> to vector<1x32xf32>
    %cst_92 = arith.constant dense<0.000000e+00> : vector<16xf32>
    %188 = vector.multi_reduction <add>, %185, %cst_92 [1] : vector<16x32xf32> to vector<16xf32>
    %189 = vector.shape_cast %188 : vector<16xf32> to vector<16x1xf32>
    %cst_93 = arith.constant 3.200000e+01 : f32
    %190 = vector.broadcast %cst_93 : f32 to vector<16x1xf32>
    %191 = arith.divf %189, %190 : vector<16x1xf32>
    %192 = vector.broadcast %191 : vector<16x1xf32> to vector<16x32xf32>
    %193 = arith.subf %185, %192 : vector<16x32xf32>
    %194 = arith.mulf %193, %193 : vector<16x32xf32>
    %cst_94 = arith.constant dense<0.000000e+00> : vector<16xf32>
    %195 = vector.multi_reduction <add>, %194, %cst_94 [1] : vector<16x32xf32> to vector<16xf32>
    %196 = vector.shape_cast %195 : vector<16xf32> to vector<16x1xf32>
    %cst_95 = arith.constant 3.200000e+01 : f32
    %197 = vector.broadcast %cst_95 : f32 to vector<16x1xf32>
    %198 = arith.divf %196, %197 : vector<16x1xf32>
    %cst_96 = arith.constant 9.99999974E-6 : f32
    %199 = vector.broadcast %cst_96 : f32 to vector<16x1xf32>
    %200 = arith.addf %198, %199 : vector<16x1xf32>
    %201 = math.rsqrt %200 : vector<16x1xf32>
    %202 = vector.broadcast %201 : vector<16x1xf32> to vector<16x32xf32>
    %203 = arith.mulf %193, %202 : vector<16x32xf32>
    %204 = vector.broadcast %186 : vector<1x32xf32> to vector<16x32xf32>
    %205 = arith.mulf %203, %204 : vector<16x32xf32>
    %206 = vector.broadcast %187 : vector<1x32xf32> to vector<16x32xf32>
    %207 = arith.addf %205, %206 : vector<16x32xf32>
    %208 = vector.extract_strided_slice %30 {offsets = [0, 64], sizes = [16, 32], strides = [1, 1]} : vector<16x192xf32> to vector<16x32xf32>
    %209 = vector.extract_strided_slice %30 {offsets = [0, 96], sizes = [16, 32], strides = [1, 1]} : vector<16x192xf32> to vector<16x32xf32>
    %cst_97 = arith.constant 0.000000e+00 : f32
    %210 = vector.broadcast %cst_97 : f32 to vector<16x32xf32>
    %211 = arith.subf %210, %209 : vector<16x32xf32>
    %212 = math.exp %211 : vector<16x32xf32>
    %cst_98 = arith.constant 1.000000e+00 : f32
    %213 = vector.broadcast %cst_98 : f32 to vector<16x32xf32>
    %214 = arith.addf %213, %212 : vector<16x32xf32>
    %cst_99 = arith.constant 1.000000e+00 : f32
    %215 = vector.broadcast %cst_99 : f32 to vector<16x32xf32>
    %216 = arith.divf %215, %214 : vector<16x32xf32>
    %217 = arith.mulf %208, %216 : vector<16x32xf32>
    %218 = arith.addf %217, %207 : vector<16x32xf32>
    %219 = vector.extract_strided_slice %122 {offsets = [0, 32], sizes = [1, 32], strides = [1, 1]} : vector<1x96xf32> to vector<1x32xf32>
    %220 = vector.extract_strided_slice %123 {offsets = [0, 32], sizes = [1, 32], strides = [1, 1]} : vector<1x96xf32> to vector<1x32xf32>
    %cst_100 = arith.constant dense<0.000000e+00> : vector<16xf32>
    %221 = vector.multi_reduction <add>, %218, %cst_100 [1] : vector<16x32xf32> to vector<16xf32>
    %222 = vector.shape_cast %221 : vector<16xf32> to vector<16x1xf32>
    %cst_101 = arith.constant 3.200000e+01 : f32
    %223 = vector.broadcast %cst_101 : f32 to vector<16x1xf32>
    %224 = arith.divf %222, %223 : vector<16x1xf32>
    %225 = vector.broadcast %224 : vector<16x1xf32> to vector<16x32xf32>
    %226 = arith.subf %218, %225 : vector<16x32xf32>
    %227 = arith.mulf %226, %226 : vector<16x32xf32>
    %cst_102 = arith.constant dense<0.000000e+00> : vector<16xf32>
    %228 = vector.multi_reduction <add>, %227, %cst_102 [1] : vector<16x32xf32> to vector<16xf32>
    %229 = vector.shape_cast %228 : vector<16xf32> to vector<16x1xf32>
    %cst_103 = arith.constant 3.200000e+01 : f32
    %230 = vector.broadcast %cst_103 : f32 to vector<16x1xf32>
    %231 = arith.divf %229, %230 : vector<16x1xf32>
    %cst_104 = arith.constant 9.99999974E-6 : f32
    %232 = vector.broadcast %cst_104 : f32 to vector<16x1xf32>
    %233 = arith.addf %231, %232 : vector<16x1xf32>
    %234 = math.rsqrt %233 : vector<16x1xf32>
    %235 = vector.broadcast %234 : vector<16x1xf32> to vector<16x32xf32>
    %236 = arith.mulf %226, %235 : vector<16x32xf32>
    %237 = vector.broadcast %219 : vector<1x32xf32> to vector<16x32xf32>
    %238 = arith.mulf %236, %237 : vector<16x32xf32>
    %239 = vector.broadcast %220 : vector<1x32xf32> to vector<16x32xf32>
    %240 = arith.addf %238, %239 : vector<16x32xf32>
    %241 = vector.extract_strided_slice %119 {offsets = [0, 1], sizes = [16, 1], strides = [1, 1]} : vector<16x3xf32> to vector<16x1xf32>
    %242 = vector.broadcast %241 : vector<16x1xf32> to vector<16x32xf32>
    %243 = arith.mulf %240, %242 : vector<16x32xf32>
    %244 = arith.addf %184, %243 : vector<16x32xf32>
    %245 = vector.extract_strided_slice %7 {offsets = [0, 64], sizes = [16, 32], strides = [1, 1]} : vector<16x96xf32> to vector<16x32xf32>
    %246 = vector.extract_strided_slice %120 {offsets = [0, 64], sizes = [1, 32], strides = [1, 1]} : vector<1x96xf32> to vector<1x32xf32>
    %247 = vector.extract_strided_slice %121 {offsets = [0, 64], sizes = [1, 32], strides = [1, 1]} : vector<1x96xf32> to vector<1x32xf32>
    %cst_105 = arith.constant dense<0.000000e+00> : vector<16xf32>
    %248 = vector.multi_reduction <add>, %245, %cst_105 [1] : vector<16x32xf32> to vector<16xf32>
    %249 = vector.shape_cast %248 : vector<16xf32> to vector<16x1xf32>
    %cst_106 = arith.constant 3.200000e+01 : f32
    %250 = vector.broadcast %cst_106 : f32 to vector<16x1xf32>
    %251 = arith.divf %249, %250 : vector<16x1xf32>
    %252 = vector.broadcast %251 : vector<16x1xf32> to vector<16x32xf32>
    %253 = arith.subf %245, %252 : vector<16x32xf32>
    %254 = arith.mulf %253, %253 : vector<16x32xf32>
    %cst_107 = arith.constant dense<0.000000e+00> : vector<16xf32>
    %255 = vector.multi_reduction <add>, %254, %cst_107 [1] : vector<16x32xf32> to vector<16xf32>
    %256 = vector.shape_cast %255 : vector<16xf32> to vector<16x1xf32>
    %cst_108 = arith.constant 3.200000e+01 : f32
    %257 = vector.broadcast %cst_108 : f32 to vector<16x1xf32>
    %258 = arith.divf %256, %257 : vector<16x1xf32>
    %cst_109 = arith.constant 9.99999974E-6 : f32
    %259 = vector.broadcast %cst_109 : f32 to vector<16x1xf32>
    %260 = arith.addf %258, %259 : vector<16x1xf32>
    %261 = math.rsqrt %260 : vector<16x1xf32>
    %262 = vector.broadcast %261 : vector<16x1xf32> to vector<16x32xf32>
    %263 = arith.mulf %253, %262 : vector<16x32xf32>
    %264 = vector.broadcast %246 : vector<1x32xf32> to vector<16x32xf32>
    %265 = arith.mulf %263, %264 : vector<16x32xf32>
    %266 = vector.broadcast %247 : vector<1x32xf32> to vector<16x32xf32>
    %267 = arith.addf %265, %266 : vector<16x32xf32>
    %268 = vector.extract_strided_slice %30 {offsets = [0, 128], sizes = [16, 32], strides = [1, 1]} : vector<16x192xf32> to vector<16x32xf32>
    %269 = vector.extract_strided_slice %30 {offsets = [0, 160], sizes = [16, 32], strides = [1, 1]} : vector<16x192xf32> to vector<16x32xf32>
    %cst_110 = arith.constant 0.000000e+00 : f32
    %270 = vector.broadcast %cst_110 : f32 to vector<16x32xf32>
    %271 = arith.subf %270, %269 : vector<16x32xf32>
    %272 = math.exp %271 : vector<16x32xf32>
    %cst_111 = arith.constant 1.000000e+00 : f32
    %273 = vector.broadcast %cst_111 : f32 to vector<16x32xf32>
    %274 = arith.addf %273, %272 : vector<16x32xf32>
    %cst_112 = arith.constant 1.000000e+00 : f32
    %275 = vector.broadcast %cst_112 : f32 to vector<16x32xf32>
    %276 = arith.divf %275, %274 : vector<16x32xf32>
    %277 = arith.mulf %268, %276 : vector<16x32xf32>
    %278 = arith.addf %277, %267 : vector<16x32xf32>
    %279 = vector.extract_strided_slice %122 {offsets = [0, 64], sizes = [1, 32], strides = [1, 1]} : vector<1x96xf32> to vector<1x32xf32>
    %280 = vector.extract_strided_slice %123 {offsets = [0, 64], sizes = [1, 32], strides = [1, 1]} : vector<1x96xf32> to vector<1x32xf32>
    %cst_113 = arith.constant dense<0.000000e+00> : vector<16xf32>
    %281 = vector.multi_reduction <add>, %278, %cst_113 [1] : vector<16x32xf32> to vector<16xf32>
    %282 = vector.shape_cast %281 : vector<16xf32> to vector<16x1xf32>
    %cst_114 = arith.constant 3.200000e+01 : f32
    %283 = vector.broadcast %cst_114 : f32 to vector<16x1xf32>
    %284 = arith.divf %282, %283 : vector<16x1xf32>
    %285 = vector.broadcast %284 : vector<16x1xf32> to vector<16x32xf32>
    %286 = arith.subf %278, %285 : vector<16x32xf32>
    %287 = arith.mulf %286, %286 : vector<16x32xf32>
    %cst_115 = arith.constant dense<0.000000e+00> : vector<16xf32>
    %288 = vector.multi_reduction <add>, %287, %cst_115 [1] : vector<16x32xf32> to vector<16xf32>
    %289 = vector.shape_cast %288 : vector<16xf32> to vector<16x1xf32>
    %cst_116 = arith.constant 3.200000e+01 : f32
    %290 = vector.broadcast %cst_116 : f32 to vector<16x1xf32>
    %291 = arith.divf %289, %290 : vector<16x1xf32>
    %cst_117 = arith.constant 9.99999974E-6 : f32
    %292 = vector.broadcast %cst_117 : f32 to vector<16x1xf32>
    %293 = arith.addf %291, %292 : vector<16x1xf32>
    %294 = math.rsqrt %293 : vector<16x1xf32>
    %295 = vector.broadcast %294 : vector<16x1xf32> to vector<16x32xf32>
    %296 = arith.mulf %286, %295 : vector<16x32xf32>
    %297 = vector.broadcast %279 : vector<1x32xf32> to vector<16x32xf32>
    %298 = arith.mulf %296, %297 : vector<16x32xf32>
    %299 = vector.broadcast %280 : vector<1x32xf32> to vector<16x32xf32>
    %300 = arith.addf %298, %299 : vector<16x32xf32>
    %301 = vector.extract_strided_slice %119 {offsets = [0, 2], sizes = [16, 1], strides = [1, 1]} : vector<16x3xf32> to vector<16x1xf32>
    %302 = vector.broadcast %301 : vector<16x1xf32> to vector<16x32xf32>
    %303 = arith.mulf %300, %302 : vector<16x32xf32>
    %304 = arith.addf %244, %303 : vector<16x32xf32>
    %c0_118 = arith.constant 0 : index
    %c0_119 = arith.constant 0 : index
    %305 = vector.load %arg26[%c0_118, %c0_119] : memref<16x32xf32, #tpu.memory_space<vmem>>, vector<16x32xf32>
    tpu.vector_store %arg26[%c0_118, %c0_119], %304 {strides = array<i32>} : memref<16x32xf32, #tpu.memory_space<vmem>>, vector<16x32xf32>,
    %c0_120 = arith.constant 0 : index
    %c0_121 = arith.constant 0 : index
    %306 = vector.load %arg27[%c0_120, %c0_121] : memref<16x3xf32, #tpu.memory_space<vmem>>, vector<16x3xf32>
    tpu.vector_store %arg27[%c0_120, %c0_121], %119 {strides = array<i32>} : memref<16x3xf32, #tpu.memory_space<vmem>>, vector<16x3xf32>,
    return
  }
  func.func @transform_0(%arg0: i32) -> (i32, i32) {
    %c0_i32 = arith.constant 0 : i32
    %c0_i32_0 = arith.constant 0 : i32
    return %arg0, %c0_i32 : i32, i32
  }
  func.func @transform_1(%arg0: i32) -> (i32, i32) {
    %c0_i32 = arith.constant 0 : i32
    %c0_i32_0 = arith.constant 0 : i32
    %c0_i32_1 = arith.constant 0 : i32
    return %c0_i32, %c0_i32_0 : i32, i32
  }
  func.func @transform_2(%arg0: i32) -> (i32, i32) {
    %c0_i32 = arith.constant 0 : i32
    %c0_i32_0 = arith.constant 0 : i32
    %c0_i32_1 = arith.constant 0 : i32
    return %c0_i32, %c0_i32_0 : i32, i32
  }
  func.func @transform_3(%arg0: i32) -> (i32, i32) {
    %c0_i32 = arith.constant 0 : i32
    %c0_i32_0 = arith.constant 0 : i32
    %c0_i32_1 = arith.constant 0 : i32
    return %c0_i32, %c0_i32_0 : i32, i32
  }
  func.func @transform_4(%arg0: i32) -> (i32, i32) {
    %c0_i32 = arith.constant 0 : i32
    %c0_i32_0 = arith.constant 0 : i32
    %c0_i32_1 = arith.constant 0 : i32
    return %c0_i32, %c0_i32_0 : i32, i32
  }
  func.func @transform_5(%arg0: i32) -> (i32, i32) {
    %c0_i32 = arith.constant 0 : i32
    %c0_i32_0 = arith.constant 0 : i32
    %c0_i32_1 = arith.constant 0 : i32
    return %c0_i32, %c0_i32_0 : i32, i32
  }
  func.func @transform_6(%arg0: i32) -> (i32, i32) {
    %c0_i32 = arith.constant 0 : i32
    %c0_i32_0 = arith.constant 0 : i32
    %c0_i32_1 = arith.constant 0 : i32
    return %c0_i32, %c0_i32_0 : i32, i32
  }
  func.func @transform_7(%arg0: i32) -> (i32, i32) {
    %c0_i32 = arith.constant 0 : i32
    %c0_i32_0 = arith.constant 0 : i32
    %c0_i32_1 = arith.constant 0 : i32
    return %c0_i32, %c0_i32_0 : i32, i32
  }
  func.func @transform_8(%arg0: i32) -> (i32, i32) {
    %c0_i32 = arith.constant 0 : i32
    %c0_i32_0 = arith.constant 0 : i32
    %c0_i32_1 = arith.constant 0 : i32
    return %c0_i32, %c0_i32_0 : i32, i32
  }
  func.func @transform_9(%arg0: i32) -> (i32, i32) {
    %c0_i32 = arith.constant 0 : i32
    %c0_i32_0 = arith.constant 0 : i32
    %c0_i32_1 = arith.constant 0 : i32
    return %c0_i32, %c0_i32_0 : i32, i32
  }
  func.func @transform_10(%arg0: i32) -> (i32, i32) {
    %c0_i32 = arith.constant 0 : i32
    %c0_i32_0 = arith.constant 0 : i32
    %c0_i32_1 = arith.constant 0 : i32
    return %c0_i32, %c0_i32_0 : i32, i32
  }
  func.func @transform_11(%arg0: i32) -> (i32, i32) {
    %c0_i32 = arith.constant 0 : i32
    %c0_i32_0 = arith.constant 0 : i32
    %c0_i32_1 = arith.constant 0 : i32
    return %c0_i32, %c0_i32_0 : i32, i32
  }
  func.func @transform_12(%arg0: i32) -> (i32, i32) {
    %c0_i32 = arith.constant 0 : i32
    %c0_i32_0 = arith.constant 0 : i32
    %c0_i32_1 = arith.constant 0 : i32
    return %c0_i32, %c0_i32_0 : i32, i32
  }
  func.func @transform_13(%arg0: i32) -> (i32, i32) {
    %c0_i32 = arith.constant 0 : i32
    %c0_i32_0 = arith.constant 0 : i32
    %c0_i32_1 = arith.constant 0 : i32
    return %c0_i32, %c0_i32_0 : i32, i32
  }
  func.func @transform_14(%arg0: i32) -> (i32, i32) {
    %c0_i32 = arith.constant 0 : i32
    %c0_i32_0 = arith.constant 0 : i32
    %c0_i32_1 = arith.constant 0 : i32
    return %c0_i32, %c0_i32_0 : i32, i32
  }
  func.func @transform_15(%arg0: i32) -> (i32, i32) {
    %c0_i32 = arith.constant 0 : i32
    %c0_i32_0 = arith.constant 0 : i32
    %c0_i32_1 = arith.constant 0 : i32
    return %c0_i32, %c0_i32_0 : i32, i32
  }
  func.func @transform_16(%arg0: i32) -> (i32, i32) {
    %c0_i32 = arith.constant 0 : i32
    %c0_i32_0 = arith.constant 0 : i32
    %c0_i32_1 = arith.constant 0 : i32
    return %c0_i32, %c0_i32_0 : i32, i32
  }
  func.func @transform_17(%arg0: i32) -> (i32, i32) {
    %c0_i32 = arith.constant 0 : i32
    %c0_i32_0 = arith.constant 0 : i32
    %c0_i32_1 = arith.constant 0 : i32
    return %c0_i32, %c0_i32_0 : i32, i32
  }
  func.func @transform_18(%arg0: i32) -> (i32, i32) {
    %c0_i32 = arith.constant 0 : i32
    %c0_i32_0 = arith.constant 0 : i32
    %c0_i32_1 = arith.constant 0 : i32
    return %c0_i32, %c0_i32_0 : i32, i32
  }
  func.func @transform_19(%arg0: i32) -> (i32, i32) {
    %c0_i32 = arith.constant 0 : i32
    %c0_i32_0 = arith.constant 0 : i32
    %c0_i32_1 = arith.constant 0 : i32
    return %c0_i32, %c0_i32_0 : i32, i32
  }
  func.func @transform_20(%arg0: i32) -> (i32, i32) {
    %c0_i32 = arith.constant 0 : i32
    %c0_i32_0 = arith.constant 0 : i32
    %c0_i32_1 = arith.constant 0 : i32
    return %c0_i32, %c0_i32_0 : i32, i32
  }
  func.func @transform_21(%arg0: i32) -> (i32, i32) {
    %c0_i32 = arith.constant 0 : i32
    %c0_i32_0 = arith.constant 0 : i32
    %c0_i32_1 = arith.constant 0 : i32
    return %c0_i32, %c0_i32_0 : i32, i32
  }
  func.func @transform_22(%arg0: i32) -> (i32, i32) {
    %c0_i32 = arith.constant 0 : i32
    %c0_i32_0 = arith.constant 0 : i32
    %c0_i32_1 = arith.constant 0 : i32
    return %c0_i32, %c0_i32_0 : i32, i32
  }
  func.func @transform_23(%arg0: i32) -> (i32, i32) {
    %c0_i32 = arith.constant 0 : i32
    %c0_i32_0 = arith.constant 0 : i32
    %c0_i32_1 = arith.constant 0 : i32
    return %c0_i32, %c0_i32_0 : i32, i32
  }
  func.func @transform_24(%arg0: i32) -> (i32, i32) {
    %c0_i32 = arith.constant 0 : i32
    %c0_i32_0 = arith.constant 0 : i32
    %c0_i32_1 = arith.constant 0 : i32
    return %c0_i32, %c0_i32_0 : i32, i32
  }
  func.func @transform_25(%arg0: i32) -> (i32, i32) {
    %c0_i32 = arith.constant 0 : i32
    %c0_i32_0 = arith.constant 0 : i32
    return %arg0, %c0_i32 : i32, i32
  }
  func.func @transform_26(%arg0: i32) -> (i32, i32) {
    %c0_i32 = arith.constant 0 : i32
    %c0_i32_0 = arith.constant 0 : i32
    return %arg0, %c0_i32 : i32, i32
  }
}

</mosaic_0001>

<bundles_post_ra>
// kernel: tpu_custom_call.1
= control target key start
LH: loop header
LB: loop body
LE: loop exit
PB: predicated region body
PF: predicated region fallthrough
CT: control target
= control target key end

     0   :  { %s2578_s0 = inlined_call_operand.vmem [shape: f32[16,3], index: 0, kind: input, shape index: {}]   ;;  %s2579_s1 = inlined_call_operand.hbm [shape: f32[3,12], index: 1, kind: input, shape index: {}]   ;;  %s2580_s2 = inlined_call_operand.hbm [shape: f32[1,12], index: 2, kind: input, shape index: {}]   ;;  %s2581_s3 = inlined_call_operand.vmem [shape: f32[12,96], index: 3, kind: input, shape index: {}]   ;;  %s2582_s4 = inlined_call_operand.hbm [shape: f32[1,96], index: 4, kind: input, shape index: {}]   ;;  %s2583_s5 = inlined_call_operand.hbm [shape: f32[1,96], index: 5, kind: input, shape index: {}]   ;;  %s2584_s6 = inlined_call_operand.vmem [shape: f32[12,12], index: 6, kind: input, shape index: {}]   ;;  %s2585_s7 = inlined_call_operand.hbm [shape: f32[1,12], index: 7, kind: input, shape index: {}]   ;;  %s2586_s8 = inlined_call_operand.hbm [shape: f32[12,12], index: 8, kind: input, shape index: {}]   ;;  %s2587_s9 = inlined_call_operand.hbm [shape: f32[1,12], index: 9, kind: input, shape index: {}]   ;;  %s2588_s10 = inlined_call_operand.vmem [shape: f32[12,192], index: 10, kind: input, shape index: {}]   ;;  %s2589_s11 = inlined_call_operand.hbm [shape: f32[1,192], index: 11, kind: input, shape index: {}]   ;;  %s2590_s12 = inlined_call_operand.hbm [shape: f32[1,96], index: 12, kind: input, shape index: {}]   ;;  %s2591_s13 = inlined_call_operand.hbm [shape: f32[1,96], index: 13, kind: input, shape index: {}]   ;;  %s2592_s14 = inlined_call_operand.vmem [shape: f32[12,3], index: 14, kind: input, shape index: {}]   ;;  %s2593_s15 = inlined_call_operand.hbm [shape: f32[1,3], index: 15, kind: input, shape index: {}]   ;;  %s2594_s16 = inlined_call_operand.hbm [shape: f32[1,3], index: 16, kind: input, shape index: {}]   ;;  %s2595_s17 = inlined_call_operand.vmem [shape: f32[12,3], index: 17, kind: input, shape index: {}]   ;;  %s2596_s18 = inlined_call_operand.hbm [shape: f32[1,3], index: 18, kind: input, shape index: {}]   ;;  %s2597_s19 = inlined_call_operand.vmem [shape: f32[3,3], index: 19, kind: input, shape index: {}]   ;;  %s2598_s20 = inlined_call_operand.hbm [shape: f32[1,3], index: 20, kind: input, shape index: {}]   ;;  %s2599_s21 = inlined_call_operand.vmem [shape: f32[3,6], index: 21, kind: input, shape index: {}]   ;;  %s2600_s22 = inlined_call_operand.vmem [shape: f32[1,6], index: 22, kind: input, shape index: {}]   ;;  %s2601_s23 = inlined_call_operand.vmem [shape: f32[1,3], index: 23, kind: input, shape index: {}]   ;;  %s2602_s24 = inlined_call_operand.vmem [shape: f32[1,3], index: 24, kind: input, shape index: {}]   ;;  %s2603_s25 = inlined_call_operand.hbm [shape: f32[16,32], index: 25, kind: output, shape index: {0}]   ;;  %s2604_s26 = inlined_call_operand.vmem [shape: f32[16,3], index: 26, kind: output, shape index: {1}]  }
   0x1   :  { %2610 = sst [smem:[#allocation35_spill]] %s2578_s0 }
   0x2   :  { %2611 = sst [smem:[#allocation36_spill]] %s2579_s1 }
   0x3   :  { %2612 = sst [smem:[#allocation37_spill]] %s2580_s2 }
   0x4   :  { %2613 = sst [smem:[#allocation38_spill]] %s2581_s3 }
   0x5   :  { %2614 = sst [smem:[#allocation39_spill]] %s2582_s4 }
   0x6   :  { %2615 = sst [smem:[#allocation40_spill]] %s2583_s5 }
   0x7   :  { %2616 = sst [smem:[#allocation41_spill]] %s2584_s6 }
   0x8   :  { %2617 = sst [smem:[#allocation42_spill]] %s2585_s7 }
   0x9   :  { %2618 = sst [smem:[#allocation43_spill]] %s2586_s8 }
   0xa   :  { %2619 = sst [smem:[#allocation44_spill]] %s2587_s9 }
   0xb   :  { %2620 = sst [smem:[#allocation45_spill]] %s2588_s10 }
   0xc   :  { %2621 = sst [smem:[#allocation46_spill]] %s2603_s25 }
   0xd   :  { %2622 = sst [smem:[#allocation47_spill]] %s2604_s26 }
   0xe   :  { %32 = vsyncpa [#allocation3], 0 }
   0xf   :  { %33 = vsyncpa [#allocation6], 0 }
  0x10   :  { %34 = vsyncpa [#allocation9], 0 }
  0x11   :  { %35 = vsyncpa [#allocation12], 0 }
  0x12   :  { %36 = vsyncpa [#allocation15], 0 }
  0x13   :  { %37 = vsyncpa [#allocation18], 0 }
  0x14   :  { %38 = vsyncpa [#allocation21], 0 }
  0x15   :  { %39 = vsyncpa [#allocation24], 0  ;;  %s2623_s7 = sld [smem:[#allocation37_spill]] }
  0x1b   :  { %s59_s28 = sshll.u32 %s2623_s7, 4  ;;  %s60_s28 = int_to_ptr.hbm [resolvable:$true] %s59_s28 }
  0x1c   :  { %40 = vsyncpa [#allocation4], 0  ;;  %s1969_s8 = smov [#allocation5]   ;;  %s2624_s9 = sld [smem:[#allocation40_spill]] }
  0x1d   :  { %s61_s4 = sshll.u32 %s1969_s8, 4  ;;  %s1970_s2 = smov [#allocation8]   ;;  %s62_s4 = int_to_ptr.vmem [resolvable:$true] %s61_s4 }
  0x1e   :  { %64 = dma.hbm_to_vmem [thread:$0]  %s60_s28, 16, %s62_s4, [#allocation6]  }
  0x1f   :  { %s85_s5 = sshll.u32 %s1970_s2, 4  ;;  %s2625_s1 = sld [smem:[#allocation43_spill]]  ;;  %s86_s5 = int_to_ptr.vmem [resolvable:$true] %s85_s5 }
  0x20   :  { %s1971_s27 = smov [#allocation11]   ;;  %s133_s26 = sshll.u32 %s2589_s11, 4  ;;  %s134_s26 = int_to_ptr.hbm [resolvable:$true] %s133_s26 }
  0x21   :  { %s108_s3 = sshll.u32 %s1971_s27, 4  ;;  %s1972_s29 = smov 128   ;;  %s109_s3 = int_to_ptr.vmem [resolvable:$true] %s108_s3 }
  0x22   :  { %s83_s30 = sshll.u32 %s2624_s9, 4  ;;  %s1973_s0 = smov 8   ;;  %s84_s30 = int_to_ptr.hbm [resolvable:$true] %s83_s30 }
  0x23   :  { %88 = dma.hbm_to_vmem [thread:$0]  %s84_s30, 16, %s86_s5, [#allocation9]  }
  0x24   :  { %s1974_s28 = smov [#allocation14]   ;;  %s155_s30 = sshll.u32 %s2591_s13, 4  ;;  %s156_s30 = int_to_ptr.hbm [resolvable:$true] %s155_s30 }
  0x25   :  { %s106_s25 = sshll.u32 %s2625_s1, 4  ;;  %s135_s4 = sshll.u32 %s1974_s28, 4  ;;  %s107_s25 = int_to_ptr.hbm [resolvable:$true] %s106_s25  ;;  %s136_s4 = int_to_ptr.vmem [resolvable:$true] %s135_s4 }
  0x26   :  { %114 = dma.hbm_to_vmem [thread:$0]  %s107_s25, 256, %s109_s3, [#allocation12], %s1972_s29, %s1972_s29, %s1973_s0  }
  0x27   :  { %138 = dma.hbm_to_vmem [thread:$0]  %s134_s26, 32, %s136_s4, [#allocation15]  }
  0x28   :  { %s179_s11 = sshll.u32 %s2594_s16, 4  ;;  %s1975_s6 = smov [#allocation17]   ;;  %s180_s11 = int_to_ptr.hbm [resolvable:$true] %s179_s11 }
  0x29   :  { %s157_s1 = sshll.u32 %s1975_s6, 4  ;;  %s1976_s25 = smov [#allocation20]   ;;  %s158_s1 = int_to_ptr.vmem [resolvable:$true] %s157_s1 }
  0x2a   :  { %160 = dma.hbm_to_vmem [thread:$0]  %s156_s30, 16, %s158_s1, [#allocation18]  }
  0x2b   :  { %s181_s27 = sshll.u32 %s1976_s25, 4  ;;  %s2626_s8 = sld [smem:[#allocation36_spill]]  ;;  %s182_s27 = int_to_ptr.vmem [resolvable:$true] %s181_s27 }
  0x2c   :  { %184 = dma.hbm_to_vmem [thread:$0]  %s180_s11, 16, %s182_s27, [#allocation21]  }
  0x2d   :  { %s2627_s4 = sld [smem:[#allocation39_spill]]  ;;  %s1977_s2 = smov [#allocation2]  }
  0x2e   :  { %s50_s16 = sshll.u32 %s1977_s2, 4  ;;  %s1978_s5 = smov [#allocation7]   ;;  %s51_s16 = int_to_ptr.vmem [resolvable:$true] %s50_s16 }
  0x2f   :  { %s74_s30 = sshll.u32 %s1978_s5, 4  ;;  %s2628_s1 = sld [smem:[#allocation42_spill]]  ;;  %s75_s30 = int_to_ptr.vmem [resolvable:$true] %s74_s30 }
  0x30   :  { %s2629_s27 = sld [smem:[#allocation44_spill]]  ;;  %s1980_s26 = smov [#allocation13]  }
  0x31   :  { %s48_s28 = sshll.u32 %s2626_s8, 4  ;;  %s1979_s8 = smov [#allocation10]   ;;  %s49_s28 = int_to_ptr.hbm [resolvable:$true] %s48_s28 }
  0x32   :  { %53 = dma.hbm_to_vmem [thread:$0]  %s49_s28, 64, %s51_s16, [#allocation3]  }
  0x33   :  { %s72_s9 = sshll.u32 %s2627_s4, 4  ;;  %s98_s13 = sshll.u32 %s1979_s8, 4  ;;  %s73_s9 = int_to_ptr.hbm [resolvable:$true] %s72_s9  ;;  %s99_s13 = int_to_ptr.vmem [resolvable:$true] %s98_s13 }
  0x34   :  { %77 = dma.hbm_to_vmem [thread:$0]  %s73_s9, 16, %s75_s30, [#allocation6]  }
  0x35   :  { %s96_s25 = sshll.u32 %s2628_s1, 4  ;;  %s122_s28 = sshll.u32 %s1980_s26, 4  ;;  %s97_s25 = int_to_ptr.hbm [resolvable:$true] %s96_s25  ;;  %s123_s28 = int_to_ptr.vmem [resolvable:$true] %s122_s28 }
  0x36   :  { %s120_s7 = sshll.u32 %s2629_s27, 4  ;;  %s144_s16 = sshll.u32 %s2590_s12, 4  ;;  %s121_s7 = int_to_ptr.hbm [resolvable:$true] %s120_s7  ;;  %s145_s16 = int_to_ptr.hbm [resolvable:$true] %s144_s16 }
  0x37   :  { %101 = dma.hbm_to_vmem [thread:$0]  %s97_s25, 16, %s99_s13, [#allocation9]  }
  0x38   :  { %125 = dma.hbm_to_vmem [thread:$0]  %s121_s7, 16, %s123_s28, [#allocation12]  }
  0x39   :  { %s168_s30 = sshll.u32 %s2593_s15, 4  ;;  %s1981_s10 = smov [#allocation16]   ;;  %s169_s30 = int_to_ptr.hbm [resolvable:$true] %s168_s30 }
  0x3a   :  { %s146_s6 = sshll.u32 %s1981_s10, 4  ;;  %s1982_s1 = smov [#allocation19]   ;;  %s147_s6 = int_to_ptr.vmem [resolvable:$true] %s146_s6 }
  0x3b   :  { %149 = dma.hbm_to_vmem [thread:$0]  %s145_s16, 16, %s147_s6, [#allocation15]  }
  0x3c   :  { %s170_s25 = sshll.u32 %s1982_s1, 4  ;;  %s192_s27 = sshll.u32 %s2596_s18, 4  ;;  %s171_s25 = int_to_ptr.vmem [resolvable:$true] %s170_s25  ;;  %s193_s27 = int_to_ptr.hbm [resolvable:$true] %s192_s27 }
  0x3d   :  { %173 = dma.hbm_to_vmem [thread:$0]  %s169_s30, 16, %s171_s25, [#allocation18]  }
  0x3e   :  { %s205_s8 = sshll.u32 %s2598_s20, 4  ;;  %s1983_s13 = smov [#allocation22]   ;;  %s206_s8 = int_to_ptr.hbm [resolvable:$true] %s205_s8 }
  0x3f   :  { %s194_s15 = sshll.u32 %s1983_s13, 4  ;;  %s1984_s26 = smov [#allocation23]   ;;  %s195_s15 = int_to_ptr.vmem [resolvable:$true] %s194_s15 }
  0x40   :  { %197 = dma.hbm_to_vmem [thread:$0]  %s193_s27, 16, %s195_s15, [#allocation21]  }
  0x41   :  { %s207_s28 = sshll.u32 %s1984_s26, 4  ;;  %s208_s28 = int_to_ptr.vmem [resolvable:$true] %s207_s28 }
  0x42   :  { %210 = dma.hbm_to_vmem [thread:$0]  %s206_s8, 16, %s208_s28, [#allocation24]  }
  0x43   :  { %1951 = dma.done.wait [#allocation3], 64  }
  0x44   :  { %1952 = vsyncadd [#allocation3], 4294967232 }
  0x45   :  { %1953 = dma.done.wait [#allocation6], 32  }
  0x46   :  { %1954 = vsyncadd [#allocation6], 4294967264 }
  0x47   :  { %1955 = dma.done.wait [#allocation9], 32  }
  0x48   :  { %1956 = vsyncadd [#allocation9], 4294967264 }
  0x49   :  { %1957 = dma.done.wait [#allocation12], 272  }
  0x4a   :  { %1958 = vsyncadd [#allocation12], 4294967024 }
  0x4b   :  { %1959 = dma.done.wait [#allocation15], 48  }
  0x4c   :  { %1960 = vsyncadd [#allocation15], 4294967248 }
  0x4d   :  { %1961 = dma.done.wait [#allocation18], 32  }
  0x4e   :  { %1962 = vsyncadd [#allocation18], 4294967264 }
  0x4f   :  { %1963 = dma.done.wait [#allocation21], 32  }
  0x50   :  { %1964 = vsyncadd [#allocation21], 4294967264 }
  0x51   :  { %1965 = dma.done.wait [#allocation24], 16  }
  0x52   :  { %1966 = vsyncadd [#allocation24], 4294967280  ;;  %vm289_vm0 = vcmask 1042432   ;;  %vm282_vm1 = vcmask 23552   ;;  %v277_v0 = vld [vmem:[#allocation2] sm:$0x7] }
  0x53   :  { %s2630_s4 = sld [smem:[#allocation35_spill]]  ;;  %1433 = vmatpush.msk.msra.mxu0 %vm289_vm0, %v277_v0  ;;  %1467 = vmatpush.msk.msra.mxu3 %vm289_vm0, %v277_v0  ;;  %vm325_vm2 = vcmask 1043456   ;;  %v1501_v7 = vld [vmem:[#allocation5] ss:$0 sm:$0xff]  ;;  %vm318_vm3 = vcmask 97280   ;;  %s1985_s15 = smov 64  }
  0x54   :  { %s2631_s30 = sld [smem:[#allocation38_spill]]  ;;  %v503_v12 = vld [vmem:[%s2592_s14 + $0x8] sm:$0xf]  ;;  %v502_v13 = vld [vmem:[%s2592_s14] sm:$0xff]  ;;  %s1986_s26 = smov 96   ;;  %v396_v16 = vld [vmem:[#allocation11] sm:$0xff] }
  0x55   :  { %s2632_s3 = sld [smem:[#allocation41_spill]]  ;;  %v397_v15 = vld [vmem:[#allocation11 + $0x8] sm:$0xf]  ;;  %v594_v17 = vld [vmem:[%s2595_s17 + $0x8] sm:$0xf]  ;;  %v593_v19 = vld [vmem:[%s2595_s17] sm:$0xff] }
  0x56   :  { %1444 = vmatpush.msk.msrb.mxu3 %vm325_vm2, %v397_v15  ;;  %v1502_v20 = vld [vmem:[#allocation10] ss:$0 sm:$0xff]  ;;  %vm869_vm6 = vcmask 261120   ;;  %v1987_v47 = vmov 3.0   ;;  %s2633_s2 = sld [smem:[#allocation45_spill]]  ;;  %s1990_s27 = smov 32  }
  0x57   :  { %v1503_v0 = vld [vmem:[#allocation13] ss:$0 sm:$0xff] }
  0x58   :  { %426 = vmatpush.msrb.mxu3 %v396_v16 }
  0x59   :  { %v275_v1 = vld [vmem:[%s2630_s4] sm:$0xff]  ;;  %v276_v2 = vld [vmem:[%s2630_s4 + $0x8] sm:$0xff]  ;;  %s2635_s4 = sld [smem:[#allocation46_spill]] }
  0x5a   :  { %1434 = vmatmul.msk.f32.vlgmr.msra.gmra.mxu0 %vm282_vm1, %v275_v1  ;;  %1435 = vmatmul.msk.f32.vlgmr.msra.gmra.mxu3 %vm282_vm1, %v276_v2  ;;  %v317_v3 = vld [vmem:[%s2631_s30 + $0x8] sm:$0xf]  ;;  %v316_v4 = vld [vmem:[%s2631_s30] sm:$0xff] }
  0x5b   :  { %1436 = vmatpush.msk.msra.mxu1 %vm325_vm2, %v317_v3  ;;  %1468 = vmatpush.msk.msra.mxu2 %vm325_vm2, %v317_v3  ;;  %v353_v5 = vld [vmem:[%s2632_s3 + $0x8] sm:$0xf]  ;;  %v352_v6 = vld [vmem:[%s2632_s3] sm:$0xff] }
  0x5c   :  { %1456 = vmatpush.msk.msra.mxu3 %vm325_vm2, %v594_v17  ;;  %v436_v48 = vld [vmem:[%s2633_s2 + $0x10] sm:$0xf]  ;;  %v437_v49 = vld [vmem:[%s2633_s2 + $0x18] sm:$0xf]  ;;  %v434_v51 = vld [vmem:[%s2633_s2] sm:$0xff] }
  0x5d   :  { %344 = vmatpush.msra.mxu1 %v316_v4  ;;  %1469 = vmatpush.msra.mxu2 %v316_v4  ;;  %v435_v52 = vld [vmem:[%s2633_s2 + $0x8] sm:$0xff]  ;;  %v637_v2 = vld [vmem:[%s2597_s19] sm:$0x7] }
  0x5e   :  { %617 = vmatpush.msra.mxu3 %v593_v19  ;;  %1447 = vmatpush.msk.msrb.mxu0 %vm325_vm2, %v436_v48 }
  0x5f   :  { %1439 = vmatpush.msk.msrb.mxu2 %vm325_vm2, %v353_v5  ;;  %1450 = vmatpush.msk.msrb.mxu1 %vm325_vm2, %v437_v49  ;;  %s1409_s2 = sshll.u32 %s2635_s4, 4  ;;  %s1410_s2 = int_to_ptr.hbm [resolvable:$true] %s1409_s2 }
  0x60   :  { %471 = vmatpush.msrb.mxu0 %v434_v51  ;;  %v674_v51 = vld [vmem:[%s2599_s21] sm:$0x7] }
  0x61   :  { %376 = vmatpush.msrb.mxu2 %v352_v6  ;;  %494 = vmatpush.msrb.mxu1 %v435_v52 }
  0x62   :  { %1461 = vmatpush.msk.msra.mxu0 %vm289_vm0, %v637_v2 }
  0xd7   :  { %v310_v8 = vpop.f32.mrf.mxu0 }
  0xd8   :  { %v311_v9 = vadd.f32 %v1501_v7, %v310_v8 }
  0xda   :  { %1437 = vmatmul.msk.f32.vlgmr.msra.gmra.mxu1 %vm318_vm3, %v311_v9 }
  0xdb   :  { %1464 = vmatpush.msk.msra.mxu1 %vm289_vm0, %v674_v51 }
  0xdd   :  { %v313_v10 = vpop.f32.mrf.mxu3 }
  0xde   :  { %v314_v11 = vadd.f32 %v1501_v7, %v313_v10  ;;  %v1504_v10 = vld [vmem:[#allocation22] ss:$0 sm:$0xff] }
  0xe0   :  { %1438 = vmatmul.msk.f32.vlgmr.msra.gmra.mxu2 %vm318_vm3, %v314_v11 }
  0xe1   :  { %1453 = vmatpush.msk.msra.mxu2 %vm325_vm2, %v503_v12 }
  0xe3   :  { %522 = vmatpush.msra.mxu2 %v502_v13 }
  0xe8   :  { %1440 = vmatmul.msk.f32.vlgmr.msrb.gmra.mxu2 %vm318_vm3, %v311_v9 }
  0xf0   :  { %1441 = vmatmul.msk.f32.gmra.mxu2 %vm318_vm3, %v314_v11 }
  0xf8   :  { %1454 = vmatmul.msk.f32.vlgmr.msra.gmra.mxu2 %vm318_vm3, %v311_v9 }
 0x100   :  { %1455 = vmatmul.msk.f32.gmra.mxu2 %vm318_vm3, %v314_v11 }
 0x157   :  { %v2213_v14 = vpop.f32.mrf.mxu1 }
 0x158   :  { %1213 = vrot.lane.b32.xlu2 %v2213_v14, %s1985_s15  ;;  %1051 = vrot.lane.b32.xlu0 %v2213_v14, %s1986_s26 }
 0x163   :  { %v2224_v18 = vpop.f32.mrf.mxu2 }
 0x164   :  { %1215 = vrot.lane.b32.xlu1 %v2224_v18, %s1985_s15  ;;  %1053 = vrot.lane.b32.xlu0 %v2224_v18, %s1986_s26 }
 0x16b   :  { %v378_v21 = vpop.f32.mrf.mxu2 }
 0x16c   :  { %v379_v22 = vadd.f32 %v1502_v20, %v378_v21 }
 0x16e   :  { %v386_v23 = vmin.f32 %v379_v22, 0.0  ;;  %vm384_vm4 = vcmp.gt.f32.partialorder %v379_v22, 0.0 }
 0x170   :  { %v388_v24 = vmul.f32 1.442695, %v386_v23 }
 0x172   :  { %1515 = vpow2.f32 %v388_v24 }
 0x173   :  { %v381_v25 = vpop.f32.mrf.mxu2 }
 0x174   :  { %v382_v26 = vadd.f32 %v1502_v20, %v381_v25 }
 0x176   :  { %v387_v27 = vmin.f32 %v382_v26, 0.0  ;;  %vm385_vm5 = vcmp.gt.f32.partialorder %v382_v26, 0.0 }
 0x178   :  { %v1516_v28 = vpop.eup %1515  ;;  %v390_v29 = vmul.f32 1.442695, %v387_v27 }
 0x179   :  { %v1442_v30 = vadd.f32 -1.0, %v1516_v28 }
 0x17a   :  { %1517 = vpow2.f32 %v390_v29 }
 0x17b   :  { %v524_v31 = vpop.f32.mrf.mxu2  ;;  %v394_v32 = vsel %vm384_vm4, %v379_v22, %v1442_v30  ;;  %1519 = vrcp.f32 %v1987_v47 }
 0x17c   :  { %1445 = vmatmul.msk.f32.vlgmr.msrb.gmra.mxu3 %vm318_vm3, %v394_v32  ;;  %v532_v34 = vsel %vm282_vm1, %v524_v31, 0.0 }
 0x180   :  { %v1518_v33 = vpop.eup %1517 }
 0x181   :  { %533 = vadd.xlane.f32.xlu2 %v532_v34  ;;  %v1443_v35 = vadd.f32 -1.0, %v1518_v33  ;;  %v1520_v50 = vpop.eup %1519 }
 0x182   :  { %v539_v53 = vmul.f32 3.0, %v1520_v50  ;;  %vm543_vm7 = vweird.f32 %v1520_v50 }
 0x183   :  { %v395_v36 = vsel %vm385_vm5, %v382_v26, %v1443_v35  ;;  %v527_v37 = vpop.f32.mrf.mxu2 }
 0x184   :  { %1446 = vmatmul.msk.f32.gmra.mxu3 %vm318_vm3, %v395_v36  ;;  %v535_v38 = vsel %vm282_vm1, %v527_v37, 0.0  ;;  %v540_v54 = vsub.f32 1.0, %v539_v53 }
 0x186   :  { %v541_v55 = vmul.f32 %v1520_v50, %v540_v54 }
 0x188   :  { %v542_v56 = vadd.f32 %v1520_v50, %v541_v55 }
 0x189   :  { %536 = vadd.xlane.f32.xlu2 %v535_v38 }
 0x18a   :  { %v2257_v57 = vsel %vm543_vm7, %v1520_v50, %v542_v56  ;;  %v2311_v50 = vld [vmem:[#allocation14] sm:$0x3] }
 0x18b   :  { %v440_v52 = vperm.slane %v2311_v50, 0  ;;  %v441_v53 = vperm.slane %v2311_v50, 1 }
 0x18c   :  { %1457 = vmatmul.msk.f32.vlgmr.msra.gmra.mxu3 %vm318_vm3, %v311_v9 }
 0x194   :  { %1458 = vmatmul.msk.f32.gmra.mxu3 %vm318_vm3, %v314_v11  ;;  %v1988_v11 = vmov 32.0  }
 0x195   :  { %1521 = vrcp.f32 %v1988_v11  ;;  %v1505_v11 = vld [vmem:[#allocation23] ss:$0 sm:$0xff] }
 0x19b   :  { %v1522_v15 = vpop.eup %1521 }
 0x19c   :  { %v877_v19 = vmul.f32 32.0, %v1522_v15  ;;  %vm881_vm9 = vweird.f32 %v1522_v15 }
 0x19e   :  { %v878_v22 = vsub.f32 1.0, %v877_v19 }
 0x1a0   :  { %v879_v27 = vmul.f32 %v1522_v15, %v878_v22 }
 0x1a2   :  { %v880_v29 = vadd.f32 %v1522_v15, %v879_v27 }
 0x1b2   :  { %v1214_v39 = vpop.permute.xlu2 %1213 }
 0x1b3   :  { %v1219_v40 = vsel %vm869_vm6, %v1214_v39, 0.0 }
 0x1b4   :  { %1220 = vadd.xlane.f32.xlu0 %v1219_v40 }
 0x1ca   :  { %v1052_v41 = vpop.permute.xlu0 %1051 }
 0x1cb   :  { %v1057_v42 = vsel %vm869_vm6, %v1052_v41, 0.0 }
 0x1cc   :  { %1058 = vadd.xlane.f32.xlu1 %v1057_v42 }
 0x1d6   :  { %v1216_v43 = vpop.permute.xlu1 %1215  ;;  %v1054_v44 = vpop.permute.xlu0 %1053 }
 0x1d7   :  { %v1222_v45 = vsel %vm869_vm6, %v1216_v43, 0.0  ;;  %v1060_v46 = vsel %vm869_vm6, %v1054_v44, 0.0 }
 0x1d8   :  { %1223 = vadd.xlane.f32.xlu0 %v1222_v45  ;;  %1061 = vadd.xlane.f32.xlu1 %v1060_v46 }
 0x1f4   :  { %v534_v58 = vpop.xlane.xlu2 %533 }
 0x1f5   :  { %v545_v59 = vmul.f32 %v2257_v57, %v534_v58 }
 0x1f7   :  { %v2260_v60 = vsub.f32 %v524_v31, %v545_v59  ;;  %v2280_v31 = vsel %vm881_vm9, %v1522_v15, %v880_v29 }
 0x1f9   :  { %v549_v61 = vmul.f32 %v2260_v60, %v2260_v60 }
 0x1fb   :  { %v551_v62 = vsel %vm282_vm1, %v549_v61, 0.0 }
 0x1fc   :  { %552 = vadd.xlane.f32.xlu2 %v551_v62  ;;  %v537_v63 = vpop.xlane.xlu2 %536 }
 0x1fd   :  { %v546_v1 = vmul.f32 %v2257_v57, %v537_v63 }
 0x1ff   :  { %v2269_v3 = vsub.f32 %v527_v37, %v546_v1  ;;  %v428_v4 = vpop.f32.mrf.mxu3 }
 0x200   :  { %v429_v5 = vadd.f32 %v1503_v0, %v428_v4 }
 0x201   :  { %v550_v6 = vmul.f32 %v2269_v3, %v2269_v3 }
 0x202   :  { %1448 = vmatmul.msk.f32.vlgmr.msrb.gmra.mxu0 %vm318_vm3, %v429_v5  ;;  %1451 = vmatmul.msk.f32.vlgmr.msrb.gmra.mxu1 %vm318_vm3, %v429_v5 }
 0x203   :  { %v554_v7 = vsel %vm282_vm1, %v550_v6, 0.0 }
 0x204   :  { %555 = vadd.xlane.f32.xlu0 %v554_v7 }
 0x207   :  { %v431_v8 = vpop.f32.mrf.mxu3 }
 0x208   :  { %v432_v9 = vadd.f32 %v1503_v0, %v431_v8 }
 0x20a   :  { %1449 = vmatmul.msk.f32.gmra.mxu0 %vm318_vm3, %v432_v9  ;;  %1452 = vmatmul.msk.f32.gmra.mxu1 %vm318_vm3, %v432_v9 }
 0x20f   :  { %v619_v12 = vpop.f32.mrf.mxu3 }
 0x210   :  { %v620_v13 = vadd.f32 %v1504_v10, %v619_v12 }
 0x212   :  { %v627_v16 = vmin.f32 %v620_v13, 0.0  ;;  %vm625_vm8 = vcmp.gt.f32.partialorder %v620_v13, 0.0 }
 0x214   :  { %v629_v17 = vmul.f32 1.442695, %v627_v16 }
 0x216   :  { %1523 = vpow2.f32 %v629_v17 }
 0x217   :  { %v622_v20 = vpop.f32.mrf.mxu3 }
 0x218   :  { %v623_v21 = vadd.f32 %v1504_v10, %v622_v20 }
 0x21a   :  { %v628_v23 = vmin.f32 %v623_v21, 0.0  ;;  %vm626_vm10 = vcmp.gt.f32.partialorder %v623_v21, 0.0 }
 0x21c   :  { %v1524_v24 = vpop.eup %1523  ;;  %v631_v25 = vmul.f32 1.442695, %v628_v23 }
 0x21d   :  { %v1459_v26 = vadd.f32 -1.0, %v1524_v24 }
 0x21e   :  { %1525 = vpow2.f32 %v631_v25 }
 0x21f   :  { %v635_v28 = vsel %vm625_vm8, %v620_v13, %v1459_v26 }
 0x220   :  { %1462 = vmatmul.msk.f32.vlgmr.msra.gmra.mxu0 %vm282_vm1, %v635_v28 }
 0x224   :  { %v1526_v30 = vpop.eup %1525 }
 0x225   :  { %v1460_v32 = vadd.f32 -1.0, %v1526_v30 }
 0x227   :  { %v1221_v33 = vpop.xlane.xlu0 %1220  ;;  %v636_v34 = vsel %vm626_vm10, %v623_v21, %v1460_v32 }
 0x228   :  { %v1225_v35 = vmul.f32 %v1221_v33, %v2280_v31  ;;  %1463 = vmatmul.msk.f32.gmra.mxu0 %vm282_vm1, %v636_v34 }
 0x22a   :  { %v2285_v36 = vsub.f32 %v2213_v14, %v1225_v35 }
 0x22c   :  { %v1229_v37 = vmul.f32 %v2285_v36, %v2285_v36 }
 0x22e   :  { %1233 = vrot.lane.b32.xlu2 %v1229_v37, %s1985_s15 }
 0x23f   :  { %v1059_v38 = vpop.xlane.xlu1 %1058 }
 0x240   :  { %v1063_v39 = vmul.f32 %v1059_v38, %v2280_v31 }
 0x242   :  { %v2292_v40 = vsub.f32 %v2213_v14, %v1063_v39 }
 0x244   :  { %v1067_v41 = vmul.f32 %v2292_v40, %v2292_v40 }
 0x246   :  { %1071 = vrot.lane.b32.xlu0 %v1067_v41, %s1986_s26 }
 0x24b   :  { %v1062_v42 = vpop.xlane.xlu1 %1061  ;;  %v1224_v44 = vpop.xlane.xlu0 %1223 }
 0x24c   :  { %v1064_v43 = vmul.f32 %v1062_v42, %v2280_v31  ;;  %v1226_v46 = vmul.f32 %v1224_v44, %v2280_v31 }
 0x24e   :  { %v2299_v45 = vsub.f32 %v2224_v18, %v1064_v43  ;;  %v2306_v48 = vsub.f32 %v2224_v18, %v1226_v46  ;;  %v873_v43 = vsel %vm869_vm6, %v2224_v18, 0.0 }
 0x250   :  { %v1068_v47 = vmul.f32 %v2299_v45, %v2299_v45  ;;  %v1230_v49 = vmul.f32 %v2306_v48, %v2306_v48 }
 0x252   :  { %1073 = vrot.lane.b32.xlu1 %v1068_v47, %s1986_s26 }
 0x25a   :  { %1235 = vrot.lane.b32.xlu1 %v1230_v49, %s1985_s15 }
 0x26f   :  { %v2337_v42 = vpop.xlane.xlu2 %552 }
 0x277   :  { %v2333_v35 = vpop.xlane.xlu0 %555 }
 0x27f   :  { %v473_v54 = vpop.f32.mrf.mxu0  ;;  %v496_v55 = vpop.f32.mrf.mxu1 }
 0x280   :  { %v2319_v56 = vadd.f32 %v473_v54, %v440_v52  ;;  %v2323_v58 = vadd.f32 %v496_v55, %v441_v53 }
 0x282   :  { %v931_v59 = vsub.f32 0.0, %v2319_v56 }
 0x284   :  { %v933_v61 = vmul.f32 1.442695, %v931_v59 }
 0x286   :  { %1527 = vpow2.f32 %v933_v61 }
 0x287   :  { %v476_v62 = vpop.f32.mrf.mxu0  ;;  %v2343_v51 = vpop.f32.mrf.mxu1 }
 0x288   :  { %v2326_v63 = vadd.f32 %v476_v62, %v440_v52  ;;  %v1234_v44 = vpop.permute.xlu2 %1233  ;;  %v1506_v52 = vld [vmem:[%s2600_s22] ss:$0 sm:$0xff]  ;;  %s1989_s22 = smov 125  }
 0x289   :  { %v1239_v46 = vsel %vm869_vm6, %v1234_v44, 0.0 }
 0x28a   :  { %v932_v0 = vsub.f32 0.0, %v2326_v63 }
 0x28c   :  { %v1528_v1 = vpop.eup %1527  ;;  %v935_v2 = vmul.f32 1.442695, %v932_v0 }
 0x28d   :  { %v937_v4 = vadd.f32 1.0, %v1528_v1 }
 0x28e   :  { %1529 = vpow2.f32 %v935_v2 }
 0x28f   :  { %1531 = vrcp.f32 %v937_v4  ;;  %v950_v10 = vand.u32 2147483648, %v937_v4  ;;  %v948_v13 = vand.u32 2147483647, %v937_v4  ;;  %vm944_vm12 = vweird.f32 %v937_v4 }
 0x291   :  { %v951_v19 = vor.u32 1.1754944e-38, %v950_v10  ;;  %vm949_vm14 = vcmp.eq.f32.partialorder %v948_v13, 8.507059e+37 }
 0x294   :  { %v1530_v5 = vpop.eup %1529 }
 0x295   :  { %v1532_v6 = vpop.eup %1531  ;;  %v938_v7 = vadd.f32 1.0, %v1530_v5 }
 0x296   :  { %v940_v8 = vmul.f32 %v1532_v6, %v937_v4  ;;  %vm945_vm11 = vweird.f32 %v1532_v6 }
 0x297   :  { %1533 = vrcp.f32 %v938_v7  ;;  %vm946_vm13 = vmor %vm944_vm12, %vm945_vm11  ;;  %v965_v25 = vand.u32 2147483648, %v938_v7  ;;  %v963_v27 = vand.u32 2147483647, %v938_v7  ;;  %vm959_vm0 = vweird.f32 %v938_v7 }
 0x298   :  { %v941_v9 = vsub.f32 1.0, %v940_v8 }
 0x299   :  { %v966_v30 = vor.u32 1.1754944e-38, %v965_v25  ;;  %vm964_vm3 = vcmp.eq.f32.partialorder %v963_v27, 8.507059e+37 }
 0x29a   :  { %v942_v12 = vmul.f32 %v1532_v6, %v941_v9 }
 0x29c   :  { %v943_v15 = vadd.f32 %v1532_v6, %v942_v12 }
 0x29d   :  { %v1534_v16 = vpop.eup %1533  ;;  %v668_v17 = vpop.f32.mrf.mxu0 }
 0x29e   :  { %v669_v20 = vadd.f32 %v1505_v11, %v668_v17  ;;  %v947_v21 = vsel %vm946_vm13, %v1532_v6, %v943_v15  ;;  %v955_v22 = vmul.f32 %v1534_v16, %v938_v7  ;;  %vm960_vm15 = vweird.f32 %v1534_v16 }
 0x29f   :  { %v952_v23 = vsel %vm949_vm14, %v951_v19, %v947_v21  ;;  %vm961_vm2 = vmor %vm959_vm0, %vm960_vm15 }
 0x2a0   :  { %1465 = vmatmul.msk.f32.vlgmr.msra.gmra.mxu1 %vm282_vm1, %v669_v20  ;;  %971 = vrot.lane.b32.xlu2 %v952_v23, %s1986_s26  ;;  %v956_v24 = vsub.f32 1.0, %v955_v22 }
 0x2a2   :  { %v957_v26 = vmul.f32 %v1534_v16, %v956_v24 }
 0x2a4   :  { %v958_v28 = vadd.f32 %v1534_v16, %v957_v26 }
 0x2a5   :  { %v671_v29 = vpop.f32.mrf.mxu0 }
 0x2a6   :  { %v672_v32 = vadd.f32 %v1505_v11, %v671_v29  ;;  %v962_v33 = vsel %vm961_vm2, %v1534_v16, %v958_v28 }
 0x2a7   :  { %v967_v34 = vsel %vm964_vm3, %v966_v30, %v962_v33 }
 0x2a8   :  { %1466 = vmatmul.msk.f32.gmra.mxu1 %vm282_vm1, %v672_v32  ;;  %973 = vrot.lane.b32.xlu0 %v967_v34, %s1986_s26 }
 0x2b8   :  { %v1072_v38 = vpop.permute.xlu0 %1071 }
 0x2b9   :  { %v1077_v41 = vsel %vm869_vm6, %v1072_v38, 0.0 }
 0x2c4   :  { %v1074_v37 = vpop.permute.xlu1 %1073 }
 0x2c5   :  { %v1080_v39 = vsel %vm869_vm6, %v1074_v37, 0.0 }
 0x2c6   :  { %1081 = vadd.xlane.f32.xlu1 %v1080_v39 }
 0x2c9   :  { %1078 = vadd.xlane.f32.xlu2 %v1077_v41  ;;  %v870_v41 = vsel %vm869_vm6, %v2213_v14, 0.0 }
 0x2cc   :  { %v1236_v47 = vpop.permute.xlu1 %1235 }
 0x2cd   :  { %v1242_v49 = vsel %vm869_vm6, %v1236_v47, 0.0 }
 0x2d2   :  { %874 = vadd.xlane.f32.xlu0 %v873_v43 }
 0x2da   :  { %1240 = vadd.xlane.f32.xlu0 %v1239_v46 }
 0x2e2   :  { %1243 = vadd.xlane.f32.xlu0 %v1242_v49 }
 0x2fa   :  { %v2354_v30 = vpop.permute.xlu2 %971 }
 0x31d   :  { %v705_v54 = vpop.f32.mrf.mxu1 }
 0x31e   :  { %v2348_v55 = vadd.f32 %v1506_v52, %v705_v54 }
 0x320   :  { %v711_v59 = vsub.f32 0.0, %v2348_v55 }
 0x322   :  { %v713_v61 = vmul.f32 1.442695, %v711_v59  ;;  %v2363_v59 = vld [vmem:[#allocation8] ss:$0 sm:$0xff] }
 0x324   :  { %1535 = vpow2.f32 %v713_v61 }
 0x325   :  { %v708_v62 = vpop.f32.mrf.mxu1 }
 0x326   :  { %v2351_v0 = vadd.f32 %v1506_v52, %v708_v62  ;;  %v2360_v52 = vld [vmem:[#allocation7] ss:$0 sm:$0xff]  ;;  %v558_v62 = vmul.f32 %v2333_v35, %v2257_v57 }
 0x328   :  { %v712_v1 = vsub.f32 0.0, %v2351_v0 }
 0x32a   :  { %v1536_v2 = vpop.eup %1535  ;;  %v715_v4 = vmul.f32 1.442695, %v712_v1  ;;  %v560_v1 = vadd.f32 1e-05, %v558_v62  ;;  %v974_v62 = vpop.permute.xlu0 %973 }
 0x32b   :  { %v717_v5 = vadd.f32 1.0, %v1536_v2 }
 0x32c   :  { %1537 = vpow2.f32 %v715_v4  ;;  %vm577_vm2 = vweird.f32 %v560_v1 }
 0x32d   :  { %1539 = vrcp.f32 %v717_v5  ;;  %v730_v11 = vand.u32 2147483648, %v717_v5  ;;  %v728_v13 = vand.u32 2147483647, %v717_v5  ;;  %vm724_vm5 = vweird.f32 %v717_v5 }
 0x32f   :  { %v731_v17 = vor.u32 1.1754944e-38, %v730_v11  ;;  %vm729_vm8 = vcmp.eq.f32.partialorder %v728_v13, 8.507059e+37  ;;  %v1509_v11 = vld [vmem:[#allocation19] ss:$0 sm:$0xff] }
 0x332   :  { %v1538_v6 = vpop.eup %1537 }
 0x333   :  { %v1540_v7 = vpop.eup %1539  ;;  %v718_v8 = vadd.f32 1.0, %v1538_v6 }
 0x334   :  { %v720_v9 = vmul.f32 %v1540_v7, %v717_v5  ;;  %vm725_vm4 = vweird.f32 %v1540_v7 }
 0x335   :  { %1541 = vrcp.f32 %v718_v8  ;;  %vm726_vm7 = vmor %vm724_vm5, %vm725_vm4  ;;  %v745_v23 = vand.u32 2147483648, %v718_v8  ;;  %v743_v25 = vand.u32 2147483647, %v718_v8  ;;  %vm739_vm10 = vweird.f32 %v718_v8 }
 0x336   :  { %v721_v10 = vsub.f32 1.0, %v720_v9 }
 0x337   :  { %v746_v27 = vor.u32 1.1754944e-38, %v745_v23  ;;  %vm744_vm12 = vcmp.eq.f32.partialorder %v743_v25, 8.507059e+37 }
 0x338   :  { %v722_v12 = vmul.f32 %v1540_v7, %v721_v10 }
 0x339   :  { %v1082_v9 = vpop.xlane.xlu1 %1081 }
 0x33a   :  { %v723_v15 = vadd.f32 %v1540_v7, %v722_v12  ;;  %v1510_v12 = vld [vmem:[#allocation20] ss:$0 sm:$0xff] }
 0x33b   :  { %v1542_v16 = vpop.eup %1541 }
 0x33c   :  { %v727_v19 = vsel %vm726_vm7, %v1540_v7, %v723_v15  ;;  %v735_v20 = vmul.f32 %v1542_v16, %v718_v8  ;;  %vm740_vm9 = vweird.f32 %v1542_v16  ;;  %v1079_v32 = vpop.xlane.xlu2 %1078 }
 0x33d   :  { %v732_v21 = vsel %vm729_vm8, %v731_v17, %v727_v19  ;;  %vm741_vm11 = vmor %vm739_vm10, %vm740_vm9  ;;  %v1083_v33 = vmul.f32 %v1079_v32, %v2280_v31  ;;  %v1084_v19 = vmul.f32 %v1082_v9, %v2280_v31  ;;  %v557_v32 = vmul.f32 %v2337_v42, %v2257_v57 }
 0x33e   :  { %751 = vrot.lane.b32.xlu2 %v732_v21, %s1989_s22  ;;  %v736_v22 = vsub.f32 1.0, %v735_v20 }
 0x33f   :  { %v1085_v34 = vadd.f32 1e-05, %v1083_v33  ;;  %v1086_v20 = vadd.f32 1e-05, %v1084_v19 }
 0x340   :  { %v737_v24 = vmul.f32 %v1542_v16, %v736_v22 }
 0x341   :  { %1543 = vrsqrt.f32 %v1085_v34  ;;  %vm1093_vm14 = vweird.f32 %v1085_v34  ;;  %vm1103_vm5 = vweird.f32 %v1086_v20 }
 0x342   :  { %v738_v26 = vadd.f32 %v1542_v16, %v737_v24  ;;  %1545 = vrsqrt.f32 %v560_v1 }
 0x343   :  { %1547 = vrsqrt.f32 %v1086_v20 }
 0x344   :  { %v742_v28 = vsel %vm741_vm11, %v1542_v16, %v738_v26 }
 0x345   :  { %v747_v29 = vsel %vm744_vm12, %v746_v27, %v742_v28 }
 0x346   :  { %753 = vrot.lane.b32.xlu1 %v747_v29, %s1989_s22 }
 0x347   :  { %v1544_v37 = vpop.eup %1543 }
 0x348   :  { %v1088_v38 = vmul.f32 %v1544_v37, %v1085_v34  ;;  %vm1094_vm13 = vweird.f32 %v1544_v37  ;;  %v1546_v2 = vpop.eup %1545 }
 0x349   :  { %vm1095_vm15 = vmor %vm1093_vm14, %vm1094_vm13  ;;  %v572_v4 = vmul.f32 %v1546_v2, %v560_v1  ;;  %vm578_vm0 = vweird.f32 %v1546_v2  ;;  %v1548_v21 = vpop.eup %1547 }
 0x34a   :  { %v1089_v39 = vmul.f32 %v1544_v37, %v1088_v38  ;;  %vm579_vm3 = vmor %vm577_vm2, %vm578_vm0  ;;  %v1098_v22 = vmul.f32 %v1548_v21, %v1086_v20  ;;  %vm1104_vm4 = vweird.f32 %v1548_v21 }
 0x34b   :  { %v573_v5 = vmul.f32 %v1546_v2, %v572_v4  ;;  %vm1105_vm7 = vmor %vm1103_vm5, %vm1104_vm4 }
 0x34c   :  { %v1090_v43 = vmul.f32 0.5, %v1089_v39  ;;  %v1099_v23 = vmul.f32 %v1548_v21, %v1098_v22 }
 0x34e   :  { %v1091_v44 = vsub.f32 1.5, %v1090_v43 }
 0x350   :  { %v1092_v46 = vmul.f32 %v1544_v37, %v1091_v44 }
 0x352   :  { %v1096_v47 = vsel %vm1095_vm15, %v1544_v37, %v1092_v46  ;;  %v559_v37 = vadd.f32 1e-05, %v557_v32 }
 0x353   :  { %v1107_v49 = vmul.f32 %v1096_v47, %v2292_v40  ;;  %v574_v40 = vmul.f32 0.5, %v573_v5  ;;  %v875_v5 = vpop.xlane.xlu0 %874 }
 0x354   :  { %1549 = vrsqrt.f32 %v559_v37  ;;  %vm567_vm9 = vweird.f32 %v559_v37 }
 0x355   :  { %v1109_v54 = vmul.f32 %v2360_v52, %v1107_v49  ;;  %v575_v6 = vsub.f32 1.5, %v574_v40  ;;  %v884_v40 = vmul.f32 %v2280_v31, %v875_v5 }
 0x357   :  { %v1111_v61 = vadd.f32 %v2363_v59, %v1109_v54  ;;  %v576_v7 = vmul.f32 %v1546_v2, %v575_v6  ;;  %v886_v6 = vsub.f32 %v2224_v18, %v884_v40 }
 0x359   :  { %v580_v8 = vsel %vm579_vm3, %v1546_v2, %v576_v7  ;;  %v888_v7 = vmul.f32 %v886_v6, %v886_v6 }
 0x35a   :  { %v582_v10 = vmul.f32 %v580_v8, %v2269_v3  ;;  %v1100_v3 = vmul.f32 0.5, %v1099_v23  ;;  %v1550_v39 = vpop.eup %1549  ;;  %v2402_v23 = vmul.f32 %v2354_v30, %v2319_v56  ;;  %v1275_v56 = vsub.f32 0.0, %v2323_v58 }
 0x35b   :  { %vm568_vm8 = vweird.f32 %v1550_v39  ;;  %v2394_v8 = vpop.xlane.xlu0 %1240 }
 0x35c   :  { %v587_v35 = vmul.f32 %v1509_v11, %v582_v10  ;;  %v1101_v28 = vsub.f32 1.5, %v1100_v3  ;;  %vm569_vm10 = vmor %vm567_vm9, %vm568_vm8 }
 0x35e   :  { %v592_v16 = vadd.f32 %v1510_v12, %v587_v35  ;;  %v1102_v29 = vmul.f32 %v1548_v21, %v1101_v28 }
 0x360   :  { %v1106_v33 = vsel %vm1105_vm7, %v1548_v21, %v1102_v29 }
 0x361   :  { %v1108_v34 = vmul.f32 %v1106_v33, %v2299_v45 }
 0x363   :  { %v1110_v38 = vmul.f32 %v2360_v52, %v1108_v34  ;;  %v2396_v9 = vpop.xlane.xlu0 %1243  ;;  %v1277_v34 = vmul.f32 1.442695, %v1275_v56 }
 0x370   :  { %871 = vadd.xlane.f32.xlu1 %v870_v41  ;;  %v562_v41 = vmul.f32 %v1550_v39, %v559_v37 }
 0x372   :  { %v563_v43 = vmul.f32 %v1550_v39, %v562_v41 }
 0x374   :  { %v564_v44 = vmul.f32 0.5, %v563_v43 }
 0x376   :  { %v565_v46 = vsub.f32 1.5, %v564_v44 }
 0x378   :  { %v566_v47 = vmul.f32 %v1550_v39, %v565_v46 }
 0x37a   :  { %v570_v42 = vsel %vm569_vm10, %v1550_v39, %v566_v47 }
 0x37b   :  { %v581_v45 = vmul.f32 %v570_v42, %v2260_v60  ;;  %v978_v42 = vmul.f32 %v974_v62, %v2326_v63 }
 0x37d   :  { %v586_v54 = vmul.f32 %v1509_v11, %v581_v45 }
 0x37f   :  { %v591_v1 = vadd.f32 %v1510_v12, %v586_v54 }
 0x389   :  { %1115 = vrot.lane.b32.xlu1 %v1111_v61, %s1990_s27 }
 0x398   :  { %v752_v49 = vpop.permute.xlu2 %751 }
 0x399   :  { %v757_v61 = vmul.f32 %v752_v49, %v2348_v55  ;;  %v892_v55 = vsel %vm869_vm6, %v888_v7, 0.0 }
 0x39b   :  { %v2385_v2 = vadd.f32 %v757_v61, %v591_v1 }
 0x39d   :  { %v763_v4 = vsel %vm282_vm1, %v2385_v2, 0.0 }
 0x3b8   :  { %v754_v13 = vpop.permute.xlu1 %753 }
 0x3b9   :  { %v758_v15 = vmul.f32 %v754_v13, %v2351_v0 }
 0x3bb   :  { %v2371_v17 = vadd.f32 %v758_v15, %v592_v16 }
 0x3bd   :  { %v766_v60 = vsel %vm282_vm1, %v2371_v17, 0.0 }
 0x3e3   :  { %v872_v24 = vpop.xlane.xlu1 %871 }
 0x3e4   :  { %v883_v25 = vmul.f32 %v2280_v31, %v872_v24 }
 0x3e6   :  { %v885_v26 = vsub.f32 %v2213_v14, %v883_v25  ;;  %v1112_v14 = vadd.f32 %v2363_v59, %v1110_v38 }
 0x3e8   :  { %v887_v27 = vmul.f32 %v885_v26, %v885_v26 }
 0x3ea   :  { %v889_v0 = vsel %vm869_vm6, %v887_v27, 0.0 }
 0x3eb   :  { %890 = vadd.xlane.f32.xlu0 %v889_v0 }
 0x3ff   :  { %1117 = vrot.lane.b32.xlu0 %v1112_v14, %s1990_s27 }
 0x429   :  { %764 = vadd.xlane.f32.xlu0 %v763_v4 }
 0x431   :  { %767 = vadd.xlane.f32.xlu0 %v766_v60 }
 0x439   :  { %893 = vadd.xlane.f32.xlu0 %v892_v55 }
 0x45e   :  { %v891_v10 = vpop.xlane.xlu0 %890 }
 0x45f   :  { %v895_v11 = vmul.f32 %v891_v10, %v2280_v31 }
 0x461   :  { %v897_v35 = vadd.f32 1e-05, %v895_v11 }
 0x463   :  { %1551 = vrsqrt.f32 %v897_v35  ;;  %vm905_vm12 = vweird.f32 %v897_v35 }
 0x469   :  { %v1552_v12 = vpop.eup %1551 }
 0x46a   :  { %v900_v13 = vmul.f32 %v1552_v12, %v897_v35  ;;  %vm906_vm11 = vweird.f32 %v1552_v12 }
 0x46b   :  { %vm907_vm13 = vmor %vm905_vm12, %vm906_vm11 }
 0x46c   :  { %v901_v18 = vmul.f32 %v1552_v12, %v900_v13 }
 0x46e   :  { %v902_v15 = vmul.f32 0.5, %v901_v18 }
 0x470   :  { %v903_v16 = vsub.f32 1.5, %v902_v15 }
 0x471   :  { %v2407_v27 = vpop.permute.xlu0 %1117 }
 0x472   :  { %v904_v19 = vmul.f32 %v1552_v12, %v903_v16 }
 0x474   :  { %v908_v20 = vsel %vm907_vm13, %v1552_v12, %v904_v19 }
 0x475   :  { %v919_v21 = vmul.f32 %v908_v20, %v885_v26 }
 0x477   :  { %v924_v22 = vmul.f32 %v2360_v52, %v919_v21 }
 0x479   :  { %v929_v24 = vadd.f32 %v2363_v59, %v924_v22 }
 0x47b   :  { %v979_v25 = vadd.f32 %v2402_v23, %v929_v24 }
 0x47d   :  { %v981_v3 = vsel %vm869_vm6, %v979_v25, 0.0 }
 0x47e   :  { %982 = vadd.xlane.f32.xlu2 %v981_v3  ;;  %v2438_v3 = vadd.f32 %v2407_v27, %v978_v42 }
 0x49c   :  { %v765_v28 = vpop.xlane.xlu0 %764 }
 0x49d   :  { %v769_v45 = vmul.f32 %v765_v28, %v2257_v57 }
 0x49f   :  { %v2418_v61 = vsub.f32 %v2385_v2, %v769_v45  ;;  %v2427_v2 = vadd.f32 %v2343_v51, %v441_v53 }
 0x4a1   :  { %v773_v4 = vmul.f32 %v2418_v61, %v2418_v61  ;;  %v1276_v12 = vsub.f32 0.0, %v2427_v2 }
 0x4a3   :  { %v775_v40 = vsel %vm282_vm1, %v773_v4, 0.0  ;;  %v1279_v13 = vmul.f32 1.442695, %v1276_v12 }
 0x4a4   :  { %v2409_v0 = vpop.xlane.xlu0 %767 }
 0x4ac   :  { %v894_v29 = vpop.xlane.xlu0 %893 }
 0x4ad   :  { %v896_v26 = vmul.f32 %v894_v29, %v2280_v31 }
 0x4af   :  { %v898_v32 = vadd.f32 1e-05, %v896_v26 }
 0x4b1   :  { %1553 = vrsqrt.f32 %v898_v32  ;;  %vm915_vm15 = vweird.f32 %v898_v32 }
 0x4b2   :  { %1555 = vpow2.f32 %v1277_v34 }
 0x4b7   :  { %v1554_v30 = vpop.eup %1553 }
 0x4b8   :  { %v910_v33 = vmul.f32 %v1554_v30, %v898_v32  ;;  %vm916_vm14 = vweird.f32 %v1554_v30  ;;  %v1556_v44 = vpop.eup %1555 }
 0x4b9   :  { %vm917_vm0 = vmor %vm915_vm15, %vm916_vm14  ;;  %v1281_v47 = vadd.f32 1.0, %v1556_v44 }
 0x4ba   :  { %v911_v37 = vmul.f32 %v1554_v30, %v910_v33 }
 0x4bb   :  { %1557 = vrcp.f32 %v1281_v47  ;;  %v1294_v7 = vand.u32 2147483648, %v1281_v47  ;;  %vm1288_vm3 = vweird.f32 %v1281_v47  ;;  %v1292_v55 = vand.u32 2147483647, %v1281_v47 }
 0x4bc   :  { %v912_v38 = vmul.f32 0.5, %v911_v37  ;;  %1559 = vpow2.f32 %v1279_v13 }
 0x4bd   :  { %v1295_v11 = vor.u32 1.1754944e-38, %v1294_v7  ;;  %vm1293_vm5 = vcmp.eq.f32.partialorder %v1292_v55, 8.507059e+37 }
 0x4be   :  { %v913_v14 = vsub.f32 1.5, %v912_v38 }
 0x4c0   :  { %v914_v39 = vmul.f32 %v1554_v30, %v913_v14 }
 0x4c1   :  { %v1558_v5 = vpop.eup %1557 }
 0x4c2   :  { %v918_v41 = vsel %vm917_vm0, %v1554_v30, %v914_v39  ;;  %v1284_v63 = vmul.f32 %v1558_v5, %v1281_v47  ;;  %vm1289_vm2 = vweird.f32 %v1558_v5  ;;  %v1560_v19 = vpop.eup %1559 }
 0x4c3   :  { %v920_v43 = vmul.f32 %v918_v41, %v886_v6  ;;  %vm1290_vm4 = vmor %vm1288_vm3, %vm1289_vm2  ;;  %v1282_v51 = vadd.f32 1.0, %v1560_v19 }
 0x4c4   :  { %v1285_v62 = vsub.f32 1.0, %v1284_v63 }
 0x4c5   :  { %v925_v46 = vmul.f32 %v2360_v52, %v920_v43  ;;  %1561 = vrcp.f32 %v1282_v51  ;;  %v1309_v28 = vand.u32 2147483648, %v1282_v51  ;;  %vm1303_vm8 = vweird.f32 %v1282_v51 }
 0x4c6   :  { %v1286_v6 = vmul.f32 %v1558_v5, %v1285_v62  ;;  %v1307_v29 = vand.u32 2147483647, %v1282_v51 }
 0x4c7   :  { %v930_v49 = vadd.f32 %v2363_v59, %v925_v46  ;;  %v1310_v32 = vor.u32 1.1754944e-38, %v1309_v28 }
 0x4c8   :  { %v1287_v60 = vadd.f32 %v1558_v5, %v1286_v6  ;;  %vm1308_vm10 = vcmp.eq.f32.partialorder %v1307_v29, 8.507059e+37 }
 0x4c9   :  { %v980_v54 = vadd.f32 %v978_v42, %v930_v49  ;;  %v1116_v42 = vpop.permute.xlu1 %1115  ;;  %v1511_v49 = vld [vmem:[%s2601_s23] ss:$0 sm:$0xff] }
 0x4ca   :  { %v1291_v10 = vsel %vm1290_vm4, %v1558_v5, %v1287_v60  ;;  %v1512_v5 = vld [vmem:[%s2602_s24] ss:$0 sm:$0xff] }
 0x4cb   :  { %v984_v1 = vsel %vm869_vm6, %v980_v54, 0.0  ;;  %v1296_v35 = vsel %vm1293_vm5, %v1295_v11, %v1291_v10  ;;  %v1562_v20 = vpop.eup %1561 }
 0x4cc   :  { %985 = vadd.xlane.f32.xlu0 %v984_v1  ;;  %v1299_v21 = vmul.f32 %v1562_v20, %v1282_v51  ;;  %vm1304_vm7 = vweird.f32 %v1562_v20 }
 0x4cd   :  { %vm1305_vm9 = vmor %vm1303_vm8, %vm1304_vm7 }
 0x4ce   :  { %v1300_v22 = vsub.f32 1.0, %v1299_v21 }
 0x4d0   :  { %v1301_v24 = vmul.f32 %v1562_v20, %v1300_v22 }
 0x4d4   :  { %776 = vadd.xlane.f32.xlu0 %v775_v40 }
 0x4e8   :  { %1315 = vrot.lane.b32.xlu0 %v1296_v35, %s1986_s26 }
 0x4f1   :  { %v983_v18 = vpop.xlane.xlu2 %982 }
 0x4f2   :  { %v987_v15 = vmul.f32 %v983_v18, %v2280_v31 }
 0x4f4   :  { %v2432_v16 = vsub.f32 %v979_v25, %v987_v15  ;;  %v1302_v25 = vadd.f32 %v1562_v20, %v1301_v24 }
 0x4f6   :  { %v991_v50 = vmul.f32 %v2432_v16, %v2432_v16  ;;  %v1306_v26 = vsel %vm1305_vm9, %v1562_v20, %v1302_v25 }
 0x4f7   :  { %v1311_v56 = vsel %vm1308_vm10, %v1310_v32, %v1306_v26 }
 0x4f8   :  { %v993_v53 = vsel %vm869_vm6, %v991_v50, 0.0 }
 0x4f9   :  { %994 = vadd.xlane.f32.xlu1 %v993_v53 }
 0x512   :  { %1127 = vrot.lane.b32.xlu1 %v2438_v3, %s1985_s15 }
 0x51a   :  { %1317 = vrot.lane.b32.xlu1 %v1311_v56, %s1986_s26  ;;  %s2634_s26 = sld [smem:[#allocation47_spill]] }
 0x53f   :  { %v986_v30 = vpop.xlane.xlu0 %985 }
 0x540   :  { %v988_v33 = vmul.f32 %v986_v30, %v2280_v31 }
 0x542   :  { %v2444_v27 = vsub.f32 %v980_v54, %v988_v33  ;;  %v2454_v54 = vadd.f32 %v1116_v42, %v2402_v23  ;;  %v1245_v23 = vmul.f32 %v2394_v8, %v2280_v31 }
 0x544   :  { %v992_v34 = vmul.f32 %v2444_v27, %v2444_v27  ;;  %v1247_v6 = vadd.f32 1e-05, %v1245_v23 }
 0x546   :  { %v996_v37 = vsel %vm869_vm6, %v992_v34, 0.0  ;;  %vm1255_vm15 = vweird.f32 %v1247_v6 }
 0x547   :  { %997 = vadd.xlane.f32.xlu2 %v996_v37  ;;  %v777_v38 = vpop.xlane.xlu0 %776 }
 0x548   :  { %v781_v14 = vmul.f32 %v777_v38, %v2257_v57 }
 0x54a   :  { %v783_v39 = vadd.f32 1e-05, %v781_v14 }
 0x54c   :  { %1563 = vrsqrt.f32 %v783_v39  ;;  %vm791_vm12 = vweird.f32 %v783_v39 }
 0x54d   :  { %1565 = vrsqrt.f32 %v1247_v6 }
 0x552   :  { %v1564_v41 = vpop.eup %1563 }
 0x553   :  { %v786_v43 = vmul.f32 %v1564_v41, %v783_v39  ;;  %vm792_vm11 = vweird.f32 %v1564_v41  ;;  %v1566_v60 = vpop.eup %1565 }
 0x554   :  { %vm793_vm13 = vmor %vm791_vm12, %vm792_vm11  ;;  %v1250_v7 = vmul.f32 %v1566_v60, %v1247_v6  ;;  %vm1256_vm14 = vweird.f32 %v1566_v60 }
 0x555   :  { %v787_v44 = vmul.f32 %v1564_v41, %v786_v43  ;;  %vm1257_vm0 = vmor %vm1255_vm15, %vm1256_vm14 }
 0x556   :  { %v1251_v10 = vmul.f32 %v1566_v60, %v1250_v7 }
 0x557   :  { %v788_v46 = vmul.f32 0.5, %v787_v44 }
 0x558   :  { %v1252_v35 = vmul.f32 0.5, %v1251_v10 }
 0x559   :  { %v789_v47 = vsub.f32 1.5, %v788_v46 }
 0x55a   :  { %v1253_v13 = vsub.f32 1.5, %v1252_v35 }
 0x55b   :  { %v790_v45 = vmul.f32 %v1564_v41, %v789_v47 }
 0x55c   :  { %v1254_v18 = vmul.f32 %v1566_v60, %v1253_v13 }
 0x55d   :  { %v794_v1 = vsel %vm793_vm13, %v1564_v41, %v790_v45 }
 0x55e   :  { %v805_v4 = vmul.f32 %v794_v1, %v2418_v61  ;;  %v770_v61 = vmul.f32 %v2409_v0, %v2257_v57  ;;  %v1258_v8 = vsel %vm1257_vm0, %v1566_v60, %v1254_v18 }
 0x55f   :  { %1125 = vrot.lane.b32.xlu2 %v2454_v54, %s1985_s15  ;;  %v1269_v15 = vmul.f32 %v1258_v8, %v2285_v36  ;;  %v1246_v36 = vmul.f32 %v2396_v9, %v2280_v31 }
 0x560   :  { %v810_v40 = vmul.f32 %v1511_v49, %v805_v4  ;;  %v772_v55 = vsub.f32 %v2371_v17, %v770_v61  ;;  %v1316_v4 = vpop.permute.xlu0 %1315 }
 0x561   :  { %v1271_v0 = vmul.f32 %v2360_v52, %v1269_v15  ;;  %v1248_v28 = vadd.f32 1e-05, %v1246_v36 }
 0x562   :  { %v2462_v63 = vadd.f32 %v1512_v5, %v810_v40  ;;  %v774_v11 = vmul.f32 %v772_v55, %v772_v55 }
 0x563   :  { %v1273_v19 = vadd.f32 %v2363_v59, %v1271_v0  ;;  %vm1265_vm7 = vweird.f32 %v1248_v28 }
 0x564   :  { %v817_v62 = vsel %vm282_vm1, %v2462_v63, -inf  ;;  %v778_v12 = vsel %vm282_vm1, %v774_v11, 0.0  ;;  %v1321_v11 = vmul.f32 %v1316_v4, %v2323_v58 }
 0x565   :  { %818 = vmax.xlane.f32.xlu1 %v817_v62 }
 0x56c   :  { %v2478_v50 = vpop.xlane.xlu1 %994 }
 0x584   :  { %v1128_v20 = vpop.permute.xlu1 %1127 }
 0x585   :  { %v1134_v21 = vsel %vm869_vm6, %v1128_v20, 0.0 }
 0x588   :  { %779 = vadd.xlane.f32.xlu2 %v778_v12  ;;  %v2511_v12 = vld [vmem:[#allocation16] ss:$0 sm:$0xff] }
 0x58c   :  { %v1318_v62 = vpop.permute.xlu1 %1317 }
 0x58d   :  { %v1322_v15 = vmul.f32 %v1318_v62, %v2427_v2 }
 0x5a0   :  { %1325 = vrot.lane.b32.xlu2 %v1273_v19, %s1985_s15 }
 0x5ba   :  { %v2476_v17 = vpop.xlane.xlu2 %997 }
 0x5c2   :  { %v1126_v53 = vpop.permute.xlu2 %1125 }
 0x5c3   :  { %v1131_v51 = vsel %vm869_vm6, %v1126_v53, 0.0 }
 0x5c4   :  { %1132 = vadd.xlane.f32.xlu0 %v1131_v51 }
 0x5c9   :  { %1135 = vadd.xlane.f32.xlu2 %v1134_v21 }
 0x5d8   :  { %v819_v60 = vpop.xlane.xlu1 %818 }
 0x5fb   :  { %v780_v22 = vpop.xlane.xlu2 %779 }
 0x5fc   :  { %v782_v24 = vmul.f32 %v780_v22, %v2257_v57  ;;  %v1991_v22 = vmov 0  }
 0x5fd   :  { %1496 = vset.pattern.permute.xlu0 %v1991_v22  ;;  %1498 = vset.pattern.permute.xlu1 %v1991_v22 }
 0x5fe   :  { %v784_v25 = vadd.f32 1e-05, %v782_v24  ;;  %v1992_v24 = vmov 1  }
 0x5ff   :  { %1499 = vset.pattern.permute.xlu2 %v1992_v24 }
 0x600   :  { %1567 = vrsqrt.f32 %v784_v25  ;;  %vm801_vm3 = vweird.f32 %v784_v25 }
 0x601   :  { %1569 = vrsqrt.f32 %v1248_v28 }
 0x606   :  { %v1568_v29 = vpop.eup %1567 }
 0x607   :  { %v796_v26 = vmul.f32 %v1568_v29, %v784_v25  ;;  %v1570_v32 = vpop.eup %1569  ;;  %vm802_vm2 = vweird.f32 %v1568_v29  ;;  %v2526_v25 = vld [vmem:[#allocation17] ss:$0 sm:$0xff] }
 0x608   :  { %v1260_v33 = vmul.f32 %v1570_v32, %v1248_v28  ;;  %vm803_vm4 = vmor %vm801_vm3, %vm802_vm2  ;;  %vm1266_vm5 = vweird.f32 %v1570_v32 }
 0x609   :  { %v797_v56 = vmul.f32 %v1568_v29, %v796_v26  ;;  %vm1267_vm8 = vmor %vm1265_vm7, %vm1266_vm5 }
 0x60a   :  { %v1261_v38 = vmul.f32 %v1570_v32, %v1260_v33 }
 0x60b   :  { %v798_v30 = vmul.f32 0.5, %v797_v56 }
 0x60c   :  { %v1262_v39 = vmul.f32 0.5, %v1261_v38 }
 0x60d   :  { %v799_v34 = vsub.f32 1.5, %v798_v30 }
 0x60e   :  { %v1263_v43 = vsub.f32 1.5, %v1262_v39 }
 0x60f   :  { %v800_v37 = vmul.f32 %v1568_v29, %v799_v34 }
 0x610   :  { %v1264_v46 = vmul.f32 %v1570_v32, %v1263_v43 }
 0x611   :  { %v804_v9 = vsel %vm803_vm4, %v1568_v29, %v800_v37 }
 0x612   :  { %v806_v14 = vmul.f32 %v804_v9, %v772_v55  ;;  %v1268_v47 = vsel %vm1267_vm8, %v1570_v32, %v1264_v46 }
 0x613   :  { %v1270_v42 = vmul.f32 %v1268_v47, %v2306_v48 }
 0x614   :  { %v811_v57 = vmul.f32 %v1511_v49, %v806_v14  ;;  %v1326_v49 = vpop.permute.xlu2 %1325  ;;  %v1993_v14 = vmov 2  }
 0x615   :  { %v1272_v45 = vmul.f32 %v2360_v52, %v1270_v42  ;;  %v2507_v35 = vadd.f32 %v1326_v49, %v1321_v11 }
 0x616   :  { %v816_v41 = vadd.f32 %v1512_v5, %v811_v57 }
 0x617   :  { %v1274_v1 = vadd.f32 %v2363_v59, %v1272_v45 }
 0x618   :  { %v820_v44 = vsel %vm282_vm1, %v816_v41, -inf }
 0x619   :  { %821 = vmax.xlane.f32.xlu0 %v820_v44 }
 0x62d   :  { %1327 = vrot.lane.b32.xlu0 %v1274_v1, %s1985_s15 }
 0x637   :  { %v1133_v5 = vpop.xlane.xlu0 %1132 }
 0x638   :  { %v1137_v40 = vmul.f32 %v1133_v5, %v2280_v31  ;;  %v999_v5 = vmul.f32 %v2478_v50, %v2280_v31 }
 0x63a   :  { %v2492_v23 = vsub.f32 %v2454_v54, %v1137_v40  ;;  %v823_v54 = vsub.f32 %v2462_v63, %v819_v60  ;;  %v1001_v40 = vadd.f32 1e-05, %v999_v5 }
 0x63c   :  { %v1136_v6 = vpop.xlane.xlu2 %1135  ;;  %v1141_v61 = vmul.f32 %v2492_v23, %v2492_v23  ;;  %v825_v7 = vmul.f32 1.442695, %v823_v54 }
 0x63d   :  { %v1138_v48 = vmul.f32 %v1136_v6, %v2280_v31 }
 0x63e   :  { %1145 = vrot.lane.b32.xlu1 %v1141_v61, %s1985_s15  ;;  %1571 = vpow2.f32 %v825_v7 }
 0x63f   :  { %v2499_v52 = vsub.f32 %v2438_v3, %v1138_v48  ;;  %v1333_v3 = vsel %vm869_vm6, %v2507_v35, 0.0 }
 0x641   :  { %v1142_v59 = vmul.f32 %v2499_v52, %v2499_v52 }
 0x643   :  { %1147 = vrot.lane.b32.xlu2 %v1142_v59, %s1985_s15 }
 0x644   :  { %v1572_v55 = vpop.eup %1571 }
 0x645   :  { %v829_v10 = vsel %vm282_vm1, %v1572_v55, 0.0 }
 0x657   :  { %830 = vadd.xlane.f32.xlu0 %v829_v10 }
 0x668   :  { %1334 = vadd.xlane.f32.xlu1 %v1333_v3 }
 0x681   :  { %1183 = vrot.lane.b32.xlu1 %v2511_v12, %s1990_s27 }
 0x68c   :  { %v822_v63 = vpop.xlane.xlu0 %821 }
 0x68d   :  { %v824_v13 = vsub.f32 %v816_v41, %v822_v63 }
 0x68f   :  { %v827_v18 = vmul.f32 1.442695, %v824_v13 }
 0x691   :  { %1573 = vpow2.f32 %v827_v18 }
 0x697   :  { %v2515_v8 = vpop.eup %1573 }
 0x698   :  { %v832_v58 = vsel %vm282_vm1, %v2515_v8, 0.0 }
 0x699   :  { %833 = vadd.xlane.f32.xlu0 %v832_v58 }
 0x69d   :  { %v1148_v21 = vpop.permute.xlu2 %1147 }
 0x69e   :  { %v1154_v36 = vsel %vm869_vm6, %v1148_v21, 0.0 }
 0x69f   :  { %v1328_v0 = vpop.permute.xlu0 %1327 }
 0x6a0   :  { %v2520_v19 = vadd.f32 %v1328_v0, %v1322_v15 }
 0x6a2   :  { %v1336_v53 = vsel %vm869_vm6, %v2520_v19, 0.0 }
 0x6a3   :  { %1337 = vadd.xlane.f32.xlu0 %v1336_v53 }
 0x6b0   :  { %v1146_v51 = vpop.permute.xlu1 %1145 }
 0x6b1   :  { %v1151_v20 = vsel %vm869_vm6, %v1146_v51, 0.0 }
 0x6b2   :  { %1152 = vadd.xlane.f32.xlu2 %v1151_v20 }
 0x6ba   :  { %1155 = vadd.xlane.f32.xlu2 %v1154_v36 }
 0x6ca   :  { %v831_v2 = vpop.xlane.xlu0 %830 }
 0x6cb   :  { %1575 = vrcp.f32 %v831_v2  ;;  %v846_v32 = vand.u32 2147483648, %v831_v2  ;;  %v844_v30 = vand.u32 2147483647, %v831_v2  ;;  %vm840_vm10 = vweird.f32 %v831_v2 }
 0x6cd   :  { %v847_v34 = vor.u32 1.1754944e-38, %v846_v32  ;;  %vm845_vm12 = vcmp.eq.f32.partialorder %v844_v30, 8.507059e+37 }
 0x6d1   :  { %v1576_v28 = vpop.eup %1575 }
 0x6d2   :  { %v836_v29 = vmul.f32 %v1576_v28, %v831_v2  ;;  %1188 = vrot.lane.b32.xlu2 %v2526_v25, %s1990_s27  ;;  %vm841_vm9 = vweird.f32 %v1576_v28 }
 0x6d3   :  { %vm842_vm11 = vmor %vm840_vm10, %vm841_vm9 }
 0x6d4   :  { %v837_v26 = vsub.f32 1.0, %v836_v29 }
 0x6d6   :  { %v838_v56 = vmul.f32 %v1576_v28, %v837_v26 }
 0x6d8   :  { %v839_v33 = vadd.f32 %v1576_v28, %v838_v56 }
 0x6da   :  { %v843_v37 = vsel %vm842_vm11, %v1576_v28, %v839_v33 }
 0x6db   :  { %v848_v38 = vsel %vm845_vm12, %v847_v34, %v843_v37  ;;  %v1335_v15 = vpop.xlane.xlu1 %1334  ;;  %v1000_v37 = vmul.f32 %v2476_v17, %v2280_v31 }
 0x6dc   :  { %v849_v9 = vmul.f32 %v1572_v55, %v848_v38 }
 0x6de   :  { %1037 = vperm.xlu0 %1496, %v849_v9   ;;  %1401 = vst.msk [vmem:[%s2634_s26] sm:$0xff] %vm282_vm1, %v849_v9 }
 0x6e6   :  { %1497 = vset.pattern.permute.xlu0 %v1992_v24 }
 0x6e7   :  { %1194 = vperm.xlu0 %1497, %v849_v9  }
 0x6ef   :  { %1377 = vrot.lane.b32.xlu0 %v2511_v12, %s1985_s15 }
 0x6f0   :  { %1500 = vset.pattern.permute.xlu0 %v1993_v14 }
 0x6f3   :  { %v1184_v2 = vpop.permute.xlu1 %1183 }
 0x6f7   :  { %1382 = vrot.lane.b32.xlu0 %v2526_v25, %s1985_s15 }
 0x6ff   :  { %1388 = vperm.xlu0 %1500, %v849_v9  }
 0x70c   :  { %v834_v39 = vpop.xlane.xlu0 %833 }
 0x70d   :  { %1577 = vrcp.f32 %v834_v39  ;;  %v861_v44 = vand.u32 2147483648, %v834_v39  ;;  %v859_v47 = vand.u32 2147483647, %v834_v39  ;;  %vm855_vm14 = vweird.f32 %v834_v39 }
 0x70e   :  { %1579 = vrsqrt.f32 %v1001_v40 }
 0x70f   :  { %v862_v45 = vor.u32 1.1754944e-38, %v861_v44  ;;  %vm860_vm0 = vcmp.eq.f32.partialorder %v859_v47, 8.507059e+37  ;;  %v1339_v47 = vmul.f32 %v1335_v15, %v2280_v31 }
 0x713   :  { %v1578_v57 = vpop.eup %1577 }
 0x714   :  { %v851_v41 = vmul.f32 %v1578_v57, %v834_v39  ;;  %vm856_vm13 = vweird.f32 %v1578_v57  ;;  %v1580_v48 = vpop.eup %1579 }
 0x715   :  { %vm857_vm15 = vmor %vm855_vm14, %vm856_vm13  ;;  %v1004_v59 = vmul.f32 %v1580_v48, %v1001_v40  ;;  %vm1010_vm2 = vweird.f32 %v1580_v48 }
 0x716   :  { %v852_v43 = vsub.f32 1.0, %v851_v41  ;;  %v1338_v58 = vpop.xlane.xlu0 %1337 }
 0x717   :  { %v1005_v60 = vmul.f32 %v1580_v48, %v1004_v59 }
 0x718   :  { %v853_v46 = vmul.f32 %v1578_v57, %v852_v43 }
 0x719   :  { %v1006_v50 = vmul.f32 0.5, %v1005_v60  ;;  %v1340_v60 = vmul.f32 %v1338_v58, %v2280_v31 }
 0x71a   :  { %v854_v42 = vadd.f32 %v1578_v57, %v853_v46 }
 0x71b   :  { %v1007_v55 = vsub.f32 1.5, %v1006_v50 }
 0x71c   :  { %v858_v1 = vsel %vm857_vm15, %v1578_v57, %v854_v42 }
 0x71d   :  { %v863_v4 = vsel %vm860_vm0, %v862_v45, %v858_v1  ;;  %v1008_v11 = vmul.f32 %v1580_v48, %v1007_v55 }
 0x71e   :  { %v864_v49 = vmul.f32 %v2515_v8, %v863_v4  ;;  %v1341_v4 = vsub.f32 %v2507_v35, %v1339_v47 }
 0x720   :  { %1392 = vperm.xlu0 %1500, %v864_v49   ;;  %1402 = vst.msk [vmem:[%s2634_s26 + $0x8] sm:$0xff] %vm282_vm1, %v864_v49  ;;  %1198 = vperm.xlu2 %1499, %v864_v49   ;;  %vm1009_vm1 = vweird.f32 %v1001_v40  ;;  %v1343_v5 = vmul.f32 %v1341_v4, %v1341_v4 }
 0x721   :  { %1042 = vperm.xlu1 %1498, %v864_v49   ;;  %vm1011_vm3 = vmor %vm1009_vm1, %vm1010_vm2 }
 0x722   :  { %v1012_v63 = vsel %vm1011_vm3, %v1580_v48, %v1008_v11 }
 0x723   :  { %v1023_v8 = vmul.f32 %v1012_v63, %v2432_v16 }
 0x725   :  { %v1153_v62 = vpop.xlane.xlu2 %1152  ;;  %v1028_v51 = vmul.f32 %v2511_v12, %v1023_v8 }
 0x726   :  { %v1157_v6 = vmul.f32 %v1153_v62, %v2280_v31 }
 0x727   :  { %v1033_v36 = vadd.f32 %v2526_v25, %v1028_v51 }
 0x728   :  { %v1159_v61 = vadd.f32 1e-05, %v1157_v6 }
 0x72a   :  { %1581 = vrsqrt.f32 %v1159_v61  ;;  %vm1167_vm5 = vweird.f32 %v1159_v61 }
 0x72d   :  { %v1156_v18 = vpop.xlane.xlu2 %1155 }
 0x72e   :  { %v1158_v0 = vmul.f32 %v1156_v18, %v2280_v31 }
 0x730   :  { %v1582_v54 = vpop.eup %1581  ;;  %v1160_v20 = vadd.f32 1e-05, %v1158_v0 }
 0x731   :  { %v1162_v7 = vmul.f32 %v1582_v54, %v1159_v61  ;;  %vm1168_vm4 = vweird.f32 %v1582_v54 }
 0x732   :  { %vm1169_vm7 = vmor %vm1167_vm5, %vm1168_vm4  ;;  %1583 = vrsqrt.f32 %v1160_v20  ;;  %vm1177_vm9 = vweird.f32 %v1160_v20 }
 0x733   :  { %v1163_v10 = vmul.f32 %v1582_v54, %v1162_v7 }
 0x735   :  { %v1164_v3 = vmul.f32 0.5, %v1163_v10  ;;  %v1189_v29 = vpop.permute.xlu2 %1188 }
 0x737   :  { %v1165_v13 = vsub.f32 1.5, %v1164_v3 }
 0x738   :  { %v1584_v26 = vpop.eup %1583 }
 0x739   :  { %v1166_v53 = vmul.f32 %v1582_v54, %v1165_v13  ;;  %v1172_v30 = vmul.f32 %v1584_v26, %v1160_v20  ;;  %vm1178_vm8 = vweird.f32 %v1584_v26 }
 0x73a   :  { %vm1179_vm10 = vmor %vm1177_vm9, %vm1178_vm8 }
 0x73b   :  { %v1170_v21 = vsel %vm1169_vm7, %v1582_v54, %v1166_v53  ;;  %v1173_v34 = vmul.f32 %v1584_v26, %v1172_v30  ;;  %v1342_v54 = vsub.f32 %v2520_v19, %v1340_v60 }
 0x73c   :  { %v1181_v22 = vmul.f32 %v1170_v21, %v2492_v23  ;;  %v1002_v23 = vadd.f32 1e-05, %v1000_v37 }
 0x73d   :  { %v1174_v38 = vmul.f32 0.5, %v1173_v34  ;;  %v1344_v50 = vmul.f32 %v1342_v54, %v1342_v54 }
 0x73e   :  { %v1186_v28 = vmul.f32 %v1184_v2, %v1181_v22  ;;  %1585 = vrsqrt.f32 %v1002_v23  ;;  %vm1019_vm12 = vweird.f32 %v1002_v23 }
 0x73f   :  { %v1175_v9 = vsub.f32 1.5, %v1174_v38  ;;  %v1348_v7 = vsel %vm869_vm6, %v1344_v50, 0.0 }
 0x740   :  { %v1191_v32 = vadd.f32 %v1189_v29, %v1186_v28 }
 0x741   :  { %v1176_v14 = vmul.f32 %v1584_v26, %v1175_v9 }
 0x743   :  { %v1180_v39 = vsel %vm1179_vm10, %v1584_v26, %v1176_v14 }
 0x744   :  { %v1586_v57 = vpop.eup %1585  ;;  %v1182_v41 = vmul.f32 %v1180_v39, %v2499_v52  ;;  %v1345_v52 = vsel %vm869_vm6, %v1343_v5, 0.0 }
 0x745   :  { %v1014_v43 = vmul.f32 %v1586_v57, %v1002_v23  ;;  %vm1020_vm11 = vweird.f32 %v1586_v57 }
 0x746   :  { %v1187_v44 = vmul.f32 %v1184_v2, %v1182_v41  ;;  %vm1021_vm13 = vmor %vm1019_vm12, %vm1020_vm11 }
 0x747   :  { %v1015_v46 = vmul.f32 %v1586_v57, %v1014_v43 }
 0x748   :  { %v1192_v42 = vadd.f32 %v1189_v29, %v1187_v44 }
 0x749   :  { %v1016_v17 = vmul.f32 0.5, %v1015_v46 }
 0x74b   :  { %v1017_v49 = vsub.f32 1.5, %v1016_v17 }
 0x74d   :  { %v1018_v40 = vmul.f32 %v1586_v57, %v1017_v49 }
 0x74f   :  { %v1022_v62 = vsel %vm1021_vm13, %v1586_v57, %v1018_v40 }
 0x750   :  { %v1038_v24 = vpop.permute.xlu0 %1037  ;;  %v1024_v6 = vmul.f32 %v1022_v62, %v2444_v27 }
 0x751   :  { %v2551_v16 = vmul.f32 %v1038_v24, %v1033_v36 }
 0x752   :  { %v1029_v61 = vmul.f32 %v2511_v12, %v1024_v6 }
 0x754   :  { %v1034_v48 = vadd.f32 %v2526_v25, %v1029_v61 }
 0x759   :  { %v1195_v56 = vpop.permute.xlu0 %1194 }
 0x75a   :  { %v1201_v33 = vmul.f32 %v1195_v56, %v1191_v32 }
 0x75c   :  { %1205 = vrot.lane.b32.xlu1 %v1201_v33, %s1985_s15 }
 0x761   :  { %v1378_v27 = vpop.permute.xlu0 %1377 }
 0x769   :  { %v1383_v18 = vpop.permute.xlu0 %1382 }
 0x771   :  { %v1389_v20 = vpop.permute.xlu0 %1388 }
 0x77a   :  { %v1199_v45 = vpop.permute.xlu2 %1198 }
 0x77b   :  { %v1202_v1 = vmul.f32 %v1199_v45, %v1192_v42 }
 0x77d   :  { %1207 = vrot.lane.b32.xlu2 %v1202_v1, %s1985_s15  ;;  %s1994_s15 = smov [#allocation25]  }
 0x77e   :  { %s1407_s18 = sshll.u32 %s1994_s15, 4  ;;  %s1408_s18 = int_to_ptr.vmem [resolvable:$true] %s1407_s18 }
 0x786   :  { %1346 = vadd.xlane.f32.xlu1 %v1345_v52 }
 0x792   :  { %v1393_v23 = vpop.permute.xlu0 %1392 }
 0x793   :  { %v1043_v59 = vpop.permute.xlu1 %1042 }
 0x794   :  { %v1046_v35 = vmul.f32 %v1043_v59, %v1034_v48 }
 0x7a6   :  { %1349 = vadd.xlane.f32.xlu2 %v1348_v7 }
 0x7ce   :  { %v1206_v55 = vpop.permute.xlu1 %1205 }
 0x7cf   :  { %v1211_v21 = vadd.f32 %v1206_v55, %v2551_v16 }
 0x7d7   :  { %v1208_v0 = vpop.permute.xlu2 %1207 }
 0x7f9   :  { %v1347_v10 = vpop.xlane.xlu1 %1346 }
 0x7fa   :  { %v1351_v11 = vmul.f32 %v1347_v10, %v2280_v31 }
 0x7fc   :  { %v1353_v3 = vadd.f32 1e-05, %v1351_v11 }
 0x7fe   :  { %1587 = vrsqrt.f32 %v1353_v3  ;;  %vm1361_vm15 = vweird.f32 %v1353_v3 }
 0x804   :  { %v1588_v12 = vpop.eup %1587 }
 0x805   :  { %v1356_v63 = vmul.f32 %v1588_v12, %v1353_v3  ;;  %vm1362_vm14 = vweird.f32 %v1588_v12 }
 0x806   :  { %vm1363_vm0 = vmor %vm1361_vm15, %vm1362_vm14 }
 0x807   :  { %v1357_v25 = vmul.f32 %v1588_v12, %v1356_v63 }
 0x809   :  { %v1358_v13 = vmul.f32 0.5, %v1357_v25 }
 0x80b   :  { %v1359_v8 = vsub.f32 1.5, %v1358_v13 }
 0x80d   :  { %v1360_v58 = vmul.f32 %v1588_v12, %v1359_v8 }
 0x80f   :  { %v1364_v19 = vsel %vm1363_vm0, %v1588_v12, %v1360_v58 }
 0x810   :  { %v1375_v15 = vmul.f32 %v1364_v19, %v1341_v4 }
 0x812   :  { %v1380_v53 = vmul.f32 %v1378_v27, %v1375_v15 }
 0x814   :  { %v1385_v51 = vadd.f32 %v1383_v18, %v1380_v53 }
 0x816   :  { %v1395_v36 = vmul.f32 %v1389_v20, %v1385_v51 }
 0x818   :  { %v1397_v22 = vadd.f32 %v1395_v36, %v1211_v21 }
 0x819   :  { %v1350_v24 = vpop.xlane.xlu2 %1349 }
 0x81a   :  { %v1352_v2 = vmul.f32 %v1350_v24, %v2280_v31  ;;  %1399 = vst.msk [vmem:[#allocation25] sm:$0xff] %vm869_vm6, %v1397_v22  ;;  %v1212_v31 = vadd.f32 %v1208_v0, %v1046_v35 }
 0x81c   :  { %v1354_v28 = vadd.f32 1e-05, %v1352_v2 }
 0x81e   :  { %1589 = vrsqrt.f32 %v1354_v28  ;;  %vm1371_vm1 = vweird.f32 %v1354_v28 }
 0x824   :  { %v1590_v29 = vpop.eup %1589 }
 0x825   :  { %v1366_v26 = vmul.f32 %v1590_v29, %v1354_v28  ;;  %vm1372_vm2 = vweird.f32 %v1590_v29 }
 0x826   :  { %vm1373_vm3 = vmor %vm1371_vm1, %vm1372_vm2 }
 0x827   :  { %v1367_v32 = vmul.f32 %v1590_v29, %v1366_v26 }
 0x829   :  { %v1368_v56 = vmul.f32 0.5, %v1367_v32 }
 0x82b   :  { %v1369_v30 = vsub.f32 1.5, %v1368_v56 }
 0x82d   :  { %v1370_v33 = vmul.f32 %v1590_v29, %v1369_v30 }
 0x82f   :  { %v1374_v34 = vsel %vm1373_vm3, %v1590_v29, %v1370_v33 }
 0x830   :  { %v1376_v16 = vmul.f32 %v1374_v34, %v1342_v54 }
 0x832   :  { %v1381_v37 = vmul.f32 %v1378_v27, %v1376_v16 }
 0x834   :  { %v1386_v38 = vadd.f32 %v1383_v18, %v1381_v37 }
 0x836   :  { %v1396_v9 = vmul.f32 %v1393_v23, %v1386_v38 }
 0x838   :  { %v1398_v14 = vadd.f32 %v1396_v9, %v1212_v31 }
 0x83a   :  { %1400 = vst.msk [vmem:[#allocation25 + $0x8] sm:$0xff] %vm869_vm6, %v1398_v14 }
 0x83b   :  { %1415 = dma.vmem_to_hbm [thread:$0]  %s1408_s18, 256, %s1410_s2, [#allocation4], %s1972_s29, %s1972_s29, %s1973_s0  }
 0x83c   :  { %1967 = dma.done.wait [#allocation4], 256  }
 0x83d   :  { %1968 = vsyncadd [#allocation4], 4294967040 }
 0x83e   :  { %1424 = vsyncpa [#allocation3], 1 }
 0x83f   :  { %1425 = vsyncpa [#allocation6], 1 }
 0x840   :  { %1426 = vsyncpa [#allocation9], 1 }
 0x841   :  { %1427 = vsyncpa [#allocation12], 1 }
 0x842   :  { %1428 = vsyncpa [#allocation15], 1 }
 0x843   :  { %1429 = vsyncpa [#allocation18], 1 }
 0x844   :  { %1430 = vsyncpa [#allocation21], 1 }
 0x845   :  { %1431 = vsyncpa [#allocation24], 1 }
 0x846   :  { %1432 = vsyncpa [#allocation4], 1 }

</bundles_post_ra>
